<compile_context>
chip_gen: v6e
topology: v6e:2x2x1
jax: 0.10.0
libtpu: 0.0.40
codegen_flags: <defaults>
</compile_context>

<pallas_src>
import functools

import jax
import jax.numpy as jnp
from jax import lax
from jax.experimental import pallas as pl
from jax.experimental.pallas import tpu as pltpu

_BN_EPS = 1e-5


def _resblock_kernel(xp_ref, b1_ref, b2_ref, bn_ref, sel_ref, selt_ref,
                     out_ref, xbf_ref, hbf_ref,
                     *, n_img, height, width, chans):
    """Fused conv1 -> bn1 -> relu -> conv2 -> bn2 -> (+res) -> relu.

    Slab layout: rows = (image, padded-row), lanes = (w, channel) -> W*C lanes.

      xp_ref   : (N*(H+2), W*C) f32   vertically zero-padded NHWC input
      b1/b2_ref: (3*W*C, W*C)   bf16  banded conv weights (one band per kh tap)
      bn_ref   : (4, C)         f32   rows = [gamma1, beta1, gamma2, beta2]
      sel_ref  : (W*C, C)       f32   lane -> channel fold selector
      selt_ref : (C, W*C)       f32   channel -> lane broadcast selector
      out_ref  : (N*(H+2), W*C) f32   result in the same padded row layout
      xbf_ref  : (N*(H+2), W*C) bf16  scratch: input cast to bf16 once
      hbf_ref  : (N*(H+2), W*C) bf16  scratch: padded h1 (conv2 input)
    """
    wc = width * chans
    hpad = height + 2
    total = n_img * hpad
    m_rows = total - 2                     # rows produced by the 3-tap slab conv
    inv_count = 1.0 / float(n_img * height * width)

    # Cast the padded activations to bf16 exactly once; all conv reads are bf16.
    xbf_ref[...] = xp_ref[...].astype(jnp.bfloat16)

    sel = sel_ref[...]                     # (wc, C)
    selt = selt_ref[...]                   # (C, wc)

    # Row-validity mask over the conv slab: acc row m = i*hpad + r is a real
    # output row iff r < H; the 2 rows at each image seam are garbage (they mix
    # the bottom pad of image i with the top of image i+1).  Built from static
    # seam comparisons (no integer mod / division needed on the VPU).
    ids = lax.broadcasted_iota(jnp.int32, (m_rows, 1), 0)
    valid = ids >= 0
    for i in range(n_img - 1):
        lo = i * hpad + height
        valid = valid & ((ids < lo) | (ids >= lo + 2))
    rowmask = valid.astype(jnp.float32)                       # (M, 1)

    def conv_slab(src_ref, w_ref):
        """3x3 conv over the whole slab: 3 banded bf16 MXU dots, f32 accumulate.
        Accumulation starts from the dy=0 dot (no zero-init + VPU add)."""
        acc = jnp.dot(src_ref[pl.ds(0, m_rows), :], w_ref[0:wc, :],
                      preferred_element_type=jnp.float32)
        for dy in (1, 2):
            acc = acc + jnp.dot(src_ref[pl.ds(dy, m_rows), :],
                                w_ref[dy * wc:(dy + 1) * wc, :],
                                preferred_element_type=jnp.float32)
        return acc                                             # (M, wc) f32

    def bn_scale_shift(acc, g_row, b_row):
        """Training-mode BN over the N*H*W valid positions -> per-lane FMA."""
        macc = acc * rowmask                                   # zero seam rows
        colsum = jnp.sum(macc, axis=0, keepdims=True)          # (1, wc)
        colsq = jnp.sum(macc * acc, axis=0, keepdims=True)     # (1, wc)
        # fold the W positions packed in lanes down to per-channel sums
        csum = jnp.dot(colsum, sel, preferred_element_type=jnp.float32)   # (1,C)
        csq = jnp.dot(colsq, sel, preferred_element_type=jnp.float32)     # (1,C)
        mean = csum * inv_count
        var = csq * inv_count - mean * mean                    # biased variance
        scale_c = g_row * lax.rsqrt(var + _BN_EPS)
        shift_c = b_row - mean * scale_c
        # broadcast per-channel scale/shift back to the W*C lane layout
        scale_l = jnp.dot(scale_c, selt, preferred_element_type=jnp.float32)
        shift_l = jnp.dot(shift_c, selt, preferred_element_type=jnp.float32)
        return scale_l, shift_l                                # (1, wc) each

    # ---- stage 1: conv1 -> bn1 -> relu; h1 stays in VMEM as bf16 ----
    acc1 = conv_slab(xbf_ref, b1_ref)
    s1, t1 = bn_scale_shift(acc1, bn_ref[0:1, :], bn_ref[1:2, :])
    h1 = jnp.maximum(acc1 * s1 + t1, 0.0) * rowmask            # seam rows -> 0
    zrow = jnp.zeros((1, wc), jnp.bfloat16)
    hbf_ref[0:1, :] = zrow                                     # top pad, image 0
    hbf_ref[total - 1:total, :] = zrow                         # bottom pad, last
    hbf_ref[pl.ds(1, m_rows), :] = h1.astype(jnp.bfloat16)     # data + seam pads

    # ---- stage 2: conv2 -> bn2 -> + residual -> relu ----
    acc2 = conv_slab(hbf_ref, b2_ref)
    s2, t2 = bn_scale_shift(acc2, bn_ref[2:3, :], bn_ref[3:4, :])
    res = xp_ref[pl.ds(1, m_rows), :]                          # residual = x (f32)
    out_ref[pl.ds(1, m_rows), :] = jnp.maximum(acc2 * s2 + t2 + res, 0.0)
    # out rows 0 and total-1 are never read by the wrapper; left unwritten.


def _banded_conv_weights(w_oihw, width):
    """(Cout, Cin, 3, 3) torch weights -> (3*W*Cin, W*Cout) banded matrices.

    For vertical tap kh, B[kh][wi*Cin+ci, wo*Cout+co] = W[co,ci,kh,wi-wo+1];
    out-of-range horizontal taps are left zero (== zero padding).
    """
    c_out, c_in = w_oihw.shape[0], w_oihw.shape[1]
    w_t = jnp.transpose(w_oihw, (2, 3, 1, 0))          # (kh, kw, ci, co)
    b = jnp.zeros((3, width * c_in, width * c_out), jnp.float32)
    for kw in range(3):
        for wo in range(width):
            wi = wo + kw - 1
            if 0 <= wi < width:
                b = b.at[:, wi * c_in:(wi + 1) * c_in,
                         wo * c_out:(wo + 1) * c_out].set(w_t[:, kw])
    return b.reshape(3 * width * c_in, width * c_out)


def prepare_resblock_params(w1_oihw, gamma1, beta1, w2_oihw, gamma2, beta2, width):
    """One-time (parameter-load-time) expansion of conv weights into banded bf16
    matrices plus BN / selector operands.  Cache the result; do NOT rebuild per
    forward call."""
    c = int(w1_oihw.shape[0])
    band1 = _banded_conv_weights(w1_oihw, width).astype(jnp.bfloat16)
    band2 = _banded_conv_weights(w2_oihw, width).astype(jnp.bfloat16)
    bn = jnp.stack([gamma1, beta1, gamma2, beta2]).astype(jnp.float32)   # (4, C)
    lane_ch = jnp.arange(width * c) % c
    sel = (lane_ch[:, None] == jnp.arange(c)[None, :]).astype(jnp.float32)  # (wc,C)
    selt = jnp.transpose(sel)                                               # (C,wc)
    return {"band1": band1, "band2": band2, "bn": bn, "sel": sel, "selt": selt}


def resblock_forward_nhwc(x_nhwc, params):
    """ResBlock.forward with NHWC in / NHWC out (preferred, transpose-free)."""
    n, h, w, c = x_nhwc.shape
    wc = w * c
    hpad = h + 2
    assert wc % 128 == 0, "W*C must be a multiple of 128 for lane-dense stores"

    # Only a vertical zero pad is materialized (1.25x the input, not a 9x
    # im2col); horizontal padding is folded into the banded weight matrices.
    xp = jnp.pad(x_nhwc, ((0, 0), (1, 1), (0, 0), (0, 0))).reshape(n * hpad, wc)

    kernel = functools.partial(_resblock_kernel, n_img=n, height=h,
                               width=w, chans=c)

    out2d = pl.pallas_call(
        kernel,
        out_shape=jax.ShapeDtypeStruct((n * hpad, wc), jnp.float32),
        grid=(1,),
        in_specs=[
            pl.BlockSpec((n * hpad, wc), lambda i: (0, 0)),
            pl.BlockSpec((3 * wc, wc), lambda i: (0, 0)),
            pl.BlockSpec((3 * wc, wc), lambda i: (0, 0)),
            pl.BlockSpec((4, c), lambda i: (0, 0)),
            pl.BlockSpec((wc, c), lambda i: (0, 0)),
            pl.BlockSpec((c, wc), lambda i: (0, 0)),
        ],
        out_specs=pl.BlockSpec((n * hpad, wc), lambda i: (0, 0)),
        scratch_shapes=[pltpu.VMEM((n * hpad, wc), jnp.bfloat16),   # bf16 input
                        pltpu.VMEM((n * hpad, wc), jnp.bfloat16)],  # padded h1
        compiler_params=pltpu.CompilerParams(
            dimension_semantics=("arbitrary",)),
    )(xp, params["band1"], params["band2"], params["bn"],
      params["sel"], params["selt"])

    # Drop the pad rows (layout plumbing only; kernel stores stay lane-dense).
    return out2d.reshape(n, hpad, w, c)[:, 1:h + 1]


@jax.jit
def resblock_forward(x_nchw, params):
    """NCHW wrapper mirroring the PyTorch module interface (transposes are
    test/interface glue; prefer resblock_forward_nhwc in NHWC pipelines)."""
    x_nhwc = jnp.transpose(x_nchw, (0, 2, 3, 1))
    out_nhwc = resblock_forward_nhwc(x_nhwc, params)
    return jnp.transpose(out_nhwc, (0, 3, 1, 2))


def resblock_reference(x_nchw, w1_oihw, g1, b1, w2_oihw, g2, b2):
    """Pure-JAX f32 reference mirroring the PyTorch module (training-mode BN)."""
    def conv(x, w):
        return lax.conv_general_dilated(
            x, w, window_strides=(1, 1), padding=((1, 1), (1, 1)),
            dimension_numbers=("NCHW", "OIHW", "NCHW"),
            precision=lax.Precision.HIGHEST)

    def bn(x, g, b):
        mean = jnp.mean(x, axis=(0, 2, 3), keepdims=True)
        var = jnp.mean((x - mean) ** 2, axis=(0, 2, 3), keepdims=True)
        xn = (x - mean) * lax.rsqrt(var + _BN_EPS)
        return xn * g.reshape(1, -1, 1, 1) + b.reshape(1, -1, 1, 1)

    out = jnp.maximum(bn(conv(x_nchw, w1_oihw), g1, b1), 0.0)
    out = bn(conv(out, w2_oihw), g2, b2)
    return jnp.maximum(out + x_nchw, 0.0)


if __name__ == "__main__":
    # Small shapes consistent with the module: inplanes = planes = 32, 8x8 board.
    N, C, H, W = 2, 32, 8, 8

    key = jax.random.PRNGKey(0)
    kx, kw1, kw2, kg1, kb1, kg2, kb2 = jax.random.split(key, 7)

    x = jax.random.normal(kx, (N, C, H, W), jnp.float32)

    fan_in = C * 3 * 3
    w1 = jax.random.normal(kw1, (C, C, 3, 3), jnp.float32) * (2.0 / fan_in) ** 0.5
    w2 = jax.random.normal(kw2, (C, C, 3, 3), jnp.float32) * (2.0 / fan_in) ** 0.5
    g1 = 1.0 + 0.1 * jax.random.normal(kg1, (C,), jnp.float32)
    b1 = 0.1 * jax.random.normal(kb1, (C,), jnp.float32)
    g2 = 1.0 + 0.1 * jax.random.normal(kg2, (C,), jnp.float32)
    b2 = 0.1 * jax.random.normal(kb2, (C,), jnp.float32)

    # One-time weight/selector preparation (cached across forwards).
    params = prepare_resblock_params(w1, g1, b1, w2, g2, b2, width=W)

    out = jax.block_until_ready(resblock_forward(x, params))

    ref = jax.block_until_ready(resblock_reference(x, w1, g1, b1, w2, g2, b2))
    assert out.shape == (N, C, H, W)
    # Tolerance sized for bf16 MXU operands (f32 accumulation & f32 BN/residual);
    # a tap/shift/statistics/mask bug would produce O(1) errors and be caught.
    assert jnp.allclose(out, ref, atol=5e-2, rtol=5e-2), (
        float(jnp.max(jnp.abs(out - ref))))

    print("KERNEL_OK")
</pallas_src>

<mosaic_0001>
module attributes {stable_mosaic.version = 11 : i64} {
  func.func @_resblock_kernel(%arg0: i32, %arg1: memref<20x256xf32, #tpu.memory_space<vmem>>, %arg2: memref<768x256xbf16, #tpu.memory_space<vmem>>, %arg3: memref<768x256xbf16, #tpu.memory_space<vmem>>, %arg4: memref<4x32xf32, #tpu.memory_space<vmem>>, %arg5: memref<256x32xf32, #tpu.memory_space<vmem>>, %arg6: memref<32x256xf32, #tpu.memory_space<vmem>>, %arg7: memref<20x256xf32, #tpu.memory_space<vmem>>, %arg8: memref<20x256xbf16, #tpu.memory_space<vmem>>, %arg9: memref<20x256xbf16, #tpu.memory_space<vmem>>) attributes {dimension_semantics = [#tpu.dimension_semantics<arbitrary>], iteration_bounds = array<i64: 1>, scalar_prefetch = 0 : i64, scratch_operands = 2 : i64, tpu.core_type = #tpu.core_type<tc>, window_params = [{pipeline_mode = #tpu.pipeline_mode<synchronous>, transform_indices = @transform_0, window_bounds = array<i64: 20, 256>}, {pipeline_mode = #tpu.pipeline_mode<synchronous>, transform_indices = @transform_1, window_bounds = array<i64: 768, 256>}, {pipeline_mode = #tpu.pipeline_mode<synchronous>, transform_indices = @transform_2, window_bounds = array<i64: 768, 256>}, {pipeline_mode = #tpu.pipeline_mode<synchronous>, transform_indices = @transform_3, window_bounds = array<i64: 4, 32>}, {pipeline_mode = #tpu.pipeline_mode<synchronous>, transform_indices = @transform_4, window_bounds = array<i64: 256, 32>}, {pipeline_mode = #tpu.pipeline_mode<synchronous>, transform_indices = @transform_5, window_bounds = array<i64: 32, 256>}, {pipeline_mode = #tpu.pipeline_mode<synchronous>, transform_indices = @transform_6, window_bounds = array<i64: 20, 256>}]} {
    %c0 = arith.constant 0 : index
    %c0_0 = arith.constant 0 : index
    %0 = vector.load %arg1[%c0, %c0_0] : memref<20x256xf32, #tpu.memory_space<vmem>>, vector<20x256xf32>
    %1 = arith.truncf %0 : vector<20x256xf32> to vector<20x256xbf16>
    %c0_1 = arith.constant 0 : index
    %c0_2 = arith.constant 0 : index
    %2 = vector.load %arg8[%c0_1, %c0_2] : memref<20x256xbf16, #tpu.memory_space<vmem>>, vector<20x256xbf16>
    tpu.vector_store %arg8[%c0_1, %c0_2], %1 {strides = array<i32>} : memref<20x256xbf16, #tpu.memory_space<vmem>>, vector<20x256xbf16>,
    %c0_3 = arith.constant 0 : index
    %c0_4 = arith.constant 0 : index
    %3 = vector.load %arg5[%c0_3, %c0_4] : memref<256x32xf32, #tpu.memory_space<vmem>>, vector<256x32xf32>
    %c0_5 = arith.constant 0 : index
    %c0_6 = arith.constant 0 : index
    %4 = vector.load %arg6[%c0_5, %c0_6] : memref<32x256xf32, #tpu.memory_space<vmem>>, vector<32x256xf32>
    %5 = tpu.iota {dimensions = array<i32: 0>} : vector<18x1xi32>
    %c0_i32 = arith.constant 0 : i32
    %6 = vector.broadcast %c0_i32 : i32 to vector<18x1xi32>
    %7 = arith.cmpi sge, %5, %6 : vector<18x1xi32>
    %c8_i32 = arith.constant 8 : i32
    %8 = vector.broadcast %c8_i32 : i32 to vector<18x1xi32>
    %9 = arith.cmpi slt, %5, %8 : vector<18x1xi32>
    %c10_i32 = arith.constant 10 : i32
    %10 = vector.broadcast %c10_i32 : i32 to vector<18x1xi32>
    %11 = arith.cmpi sge, %5, %10 : vector<18x1xi32>
    %12 = arith.ori %9, %11 : vector<18x1xi1>
    %13 = arith.andi %7, %12 : vector<18x1xi1>
    %14 = arith.extui %13 : vector<18x1xi1> to vector<18x1xi32>
    %15 = arith.sitofp %14 : vector<18x1xi32> to vector<18x1xf32>
    %c0_7 = arith.constant 0 : index
    %c0_8 = arith.constant 0 : index
    %16 = vector.load %arg8[%c0_7, %c0_8] : memref<20x256xbf16, #tpu.memory_space<vmem>>, vector<18x256xbf16>
    %c0_9 = arith.constant 0 : index
    %c0_10 = arith.constant 0 : index
    %17 = vector.load %arg2[%c0_9, %c0_10] : memref<768x256xbf16, #tpu.memory_space<vmem>>, vector<256x256xbf16>
    %cst = arith.constant dense<0.000000e+00> : vector<18x256xf32>
    %18 = tpu.matmul %16, %17, %cst {dimension_numbers = #tpu.dot_dimension_numbers<[1], [0], [0], [1], [0, 0, 1, 1], [], []>} : vector<18x256xbf16>, vector<256x256xbf16>, vector<18x256xf32> -> vector<18x256xf32>
    %c1 = arith.constant 1 : index
    %c0_11 = arith.constant 0 : index
    %19 = vector.load %arg8[%c1, %c0_11] : memref<20x256xbf16, #tpu.memory_space<vmem>>, vector<18x256xbf16>
    %c256 = arith.constant 256 : index
    %c0_12 = arith.constant 0 : index
    %20 = vector.load %arg2[%c256, %c0_12] : memref<768x256xbf16, #tpu.memory_space<vmem>>, vector<256x256xbf16>
    %cst_13 = arith.constant dense<0.000000e+00> : vector<18x256xf32>
    %21 = tpu.matmul %19, %20, %cst_13 {dimension_numbers = #tpu.dot_dimension_numbers<[1], [0], [0], [1], [0, 0, 1, 1], [], []>} : vector<18x256xbf16>, vector<256x256xbf16>, vector<18x256xf32> -> vector<18x256xf32>
    %22 = arith.addf %18, %21 : vector<18x256xf32>
    %c2 = arith.constant 2 : index
    %c0_14 = arith.constant 0 : index
    %23 = vector.load %arg8[%c2, %c0_14] : memref<20x256xbf16, #tpu.memory_space<vmem>>, vector<18x256xbf16>
    %c512 = arith.constant 512 : index
    %c0_15 = arith.constant 0 : index
    %24 = vector.load %arg2[%c512, %c0_15] : memref<768x256xbf16, #tpu.memory_space<vmem>>, vector<256x256xbf16>
    %cst_16 = arith.constant dense<0.000000e+00> : vector<18x256xf32>
    %25 = tpu.matmul %23, %24, %cst_16 {dimension_numbers = #tpu.dot_dimension_numbers<[1], [0], [0], [1], [0, 0, 1, 1], [], []>} : vector<18x256xbf16>, vector<256x256xbf16>, vector<18x256xf32> -> vector<18x256xf32>
    %26 = arith.addf %22, %25 : vector<18x256xf32>
    %c0_17 = arith.constant 0 : index
    %c0_18 = arith.constant 0 : index
    %27 = vector.load %arg4[%c0_17, %c0_18] : memref<4x32xf32, #tpu.memory_space<vmem>>, vector<1x32xf32>
    %c1_19 = arith.constant 1 : index
    %c0_20 = arith.constant 0 : index
    %28 = vector.load %arg4[%c1_19, %c0_20] : memref<4x32xf32, #tpu.memory_space<vmem>>, vector<1x32xf32>
    %29 = vector.broadcast %15 : vector<18x1xf32> to vector<18x256xf32>
    %30 = arith.mulf %26, %29 : vector<18x256xf32>
    %cst_21 = arith.constant dense<0.000000e+00> : vector<256xf32>
    %31 = vector.multi_reduction <add>, %30, %cst_21 [0] : vector<18x256xf32> to vector<256xf32>
    %32 = vector.shape_cast %31 : vector<256xf32> to vector<1x256xf32>
    %33 = arith.mulf %30, %26 : vector<18x256xf32>
    %cst_22 = arith.constant dense<0.000000e+00> : vector<256xf32>
    %34 = vector.multi_reduction <add>, %33, %cst_22 [0] : vector<18x256xf32> to vector<256xf32>
    %35 = vector.shape_cast %34 : vector<256xf32> to vector<1x256xf32>
    %cst_23 = arith.constant dense<0.000000e+00> : vector<1x32xf32>
    %36 = tpu.matmul %32, %3, %cst_23 {dimension_numbers = #tpu.dot_dimension_numbers<[1], [0], [0], [1], [0, 0, 1, 1], [], []>} : vector<1x256xf32>, vector<256x32xf32>, vector<1x32xf32> -> vector<1x32xf32>
    %cst_24 = arith.constant dense<0.000000e+00> : vector<1x32xf32>
    %37 = tpu.matmul %35, %3, %cst_24 {dimension_numbers = #tpu.dot_dimension_numbers<[1], [0], [0], [1], [0, 0, 1, 1], [], []>} : vector<1x256xf32>, vector<256x32xf32>, vector<1x32xf32> -> vector<1x32xf32>
    %cst_25 = arith.constant 7.812500e-03 : f32
    %38 = vector.broadcast %cst_25 : f32 to vector<1x32xf32>
    %39 = arith.mulf %36, %38 : vector<1x32xf32>
    %cst_26 = arith.constant 7.812500e-03 : f32
    %40 = vector.broadcast %cst_26 : f32 to vector<1x32xf32>
    %41 = arith.mulf %37, %40 : vector<1x32xf32>
    %42 = arith.mulf %39, %39 : vector<1x32xf32>
    %43 = arith.subf %41, %42 : vector<1x32xf32>
    %cst_27 = arith.constant 9.99999974E-6 : f32
    %44 = vector.broadcast %cst_27 : f32 to vector<1x32xf32>
    %45 = arith.addf %43, %44 : vector<1x32xf32>
    %46 = math.rsqrt %45 : vector<1x32xf32>
    %47 = arith.mulf %27, %46 : vector<1x32xf32>
    %48 = arith.mulf %39, %47 : vector<1x32xf32>
    %49 = arith.subf %28, %48 : vector<1x32xf32>
    %cst_28 = arith.constant dense<0.000000e+00> : vector<1x256xf32>
    %50 = tpu.matmul %47, %4, %cst_28 {dimension_numbers = #tpu.dot_dimension_numbers<[1], [0], [0], [1], [0, 0, 1, 1], [], []>} : vector<1x32xf32>, vector<32x256xf32>, vector<1x256xf32> -> vector<1x256xf32>
    %cst_29 = arith.constant dense<0.000000e+00> : vector<1x256xf32>
    %51 = tpu.matmul %49, %4, %cst_29 {dimension_numbers = #tpu.dot_dimension_numbers<[1], [0], [0], [1], [0, 0, 1, 1], [], []>} : vector<1x32xf32>, vector<32x256xf32>, vector<1x256xf32> -> vector<1x256xf32>
    %52 = vector.broadcast %50 : vector<1x256xf32> to vector<18x256xf32>
    %53 = arith.mulf %26, %52 : vector<18x256xf32>
    %54 = vector.broadcast %51 : vector<1x256xf32> to vector<18x256xf32>
    %55 = arith.addf %53, %54 : vector<18x256xf32>
    %cst_30 = arith.constant 0.000000e+00 : f32
    %56 = vector.broadcast %cst_30 : f32 to vector<18x256xf32>
    %57 = arith.maximumf %55, %56 : vector<18x256xf32>
    %58 = vector.broadcast %15 : vector<18x1xf32> to vector<18x256xf32>
    %59 = arith.mulf %57, %58 : vector<18x256xf32>
    %cst_31 = arith.constant 0.000000e+00 : bf16
    %60 = vector.broadcast %cst_31 : bf16 to vector<1x256xbf16>
    %c0_32 = arith.constant 0 : index
    %c0_33 = arith.constant 0 : index
    %61 = vector.load %arg9[%c0_32, %c0_33] : memref<20x256xbf16, #tpu.memory_space<vmem>>, vector<1x256xbf16>
    tpu.vector_store %arg9[%c0_32, %c0_33], %60 {strides = array<i32>} : memref<20x256xbf16, #tpu.memory_space<vmem>>, vector<1x256xbf16>,
    %c19 = arith.constant 19 : index
    %c0_34 = arith.constant 0 : index
    %62 = vector.load %arg9[%c19, %c0_34] : memref<20x256xbf16, #tpu.memory_space<vmem>>, vector<1x256xbf16>
    tpu.vector_store %arg9[%c19, %c0_34], %60 {strides = array<i32>} : memref<20x256xbf16, #tpu.memory_space<vmem>>, vector<1x256xbf16>,
    %63 = arith.truncf %59 : vector<18x256xf32> to vector<18x256xbf16>
    %c1_35 = arith.constant 1 : index
    %c0_36 = arith.constant 0 : index
    %64 = vector.load %arg9[%c1_35, %c0_36] : memref<20x256xbf16, #tpu.memory_space<vmem>>, vector<18x256xbf16>
    tpu.vector_store %arg9[%c1_35, %c0_36], %63 {strides = array<i32>} : memref<20x256xbf16, #tpu.memory_space<vmem>>, vector<18x256xbf16>,
    %c0_37 = arith.constant 0 : index
    %c0_38 = arith.constant 0 : index
    %65 = vector.load %arg9[%c0_37, %c0_38] : memref<20x256xbf16, #tpu.memory_space<vmem>>, vector<18x256xbf16>
    %c0_39 = arith.constant 0 : index
    %c0_40 = arith.constant 0 : index
    %66 = vector.load %arg3[%c0_39, %c0_40] : memref<768x256xbf16, #tpu.memory_space<vmem>>, vector<256x256xbf16>
    %cst_41 = arith.constant dense<0.000000e+00> : vector<18x256xf32>
    %67 = tpu.matmul %65, %66, %cst_41 {dimension_numbers = #tpu.dot_dimension_numbers<[1], [0], [0], [1], [0, 0, 1, 1], [], []>} : vector<18x256xbf16>, vector<256x256xbf16>, vector<18x256xf32> -> vector<18x256xf32>
    %c1_42 = arith.constant 1 : index
    %c0_43 = arith.constant 0 : index
    %68 = vector.load %arg9[%c1_42, %c0_43] : memref<20x256xbf16, #tpu.memory_space<vmem>>, vector<18x256xbf16>
    %c256_44 = arith.constant 256 : index
    %c0_45 = arith.constant 0 : index
    %69 = vector.load %arg3[%c256_44, %c0_45] : memref<768x256xbf16, #tpu.memory_space<vmem>>, vector<256x256xbf16>
    %cst_46 = arith.constant dense<0.000000e+00> : vector<18x256xf32>
    %70 = tpu.matmul %68, %69, %cst_46 {dimension_numbers = #tpu.dot_dimension_numbers<[1], [0], [0], [1], [0, 0, 1, 1], [], []>} : vector<18x256xbf16>, vector<256x256xbf16>, vector<18x256xf32> -> vector<18x256xf32>
    %71 = arith.addf %67, %70 : vector<18x256xf32>
    %c2_47 = arith.constant 2 : index
    %c0_48 = arith.constant 0 : index
    %72 = vector.load %arg9[%c2_47, %c0_48] : memref<20x256xbf16, #tpu.memory_space<vmem>>, vector<18x256xbf16>
    %c512_49 = arith.constant 512 : index
    %c0_50 = arith.constant 0 : index
    %73 = vector.load %arg3[%c512_49, %c0_50] : memref<768x256xbf16, #tpu.memory_space<vmem>>, vector<256x256xbf16>
    %cst_51 = arith.constant dense<0.000000e+00> : vector<18x256xf32>
    %74 = tpu.matmul %72, %73, %cst_51 {dimension_numbers = #tpu.dot_dimension_numbers<[1], [0], [0], [1], [0, 0, 1, 1], [], []>} : vector<18x256xbf16>, vector<256x256xbf16>, vector<18x256xf32> -> vector<18x256xf32>
    %75 = arith.addf %71, %74 : vector<18x256xf32>
    %c2_52 = arith.constant 2 : index
    %c0_53 = arith.constant 0 : index
    %76 = vector.load %arg4[%c2_52, %c0_53] : memref<4x32xf32, #tpu.memory_space<vmem>>, vector<1x32xf32>
    %c3 = arith.constant 3 : index
    %c0_54 = arith.constant 0 : index
    %77 = vector.load %arg4[%c3, %c0_54] : memref<4x32xf32, #tpu.memory_space<vmem>>, vector<1x32xf32>
    %78 = vector.broadcast %15 : vector<18x1xf32> to vector<18x256xf32>
    %79 = arith.mulf %75, %78 : vector<18x256xf32>
    %cst_55 = arith.constant dense<0.000000e+00> : vector<256xf32>
    %80 = vector.multi_reduction <add>, %79, %cst_55 [0] : vector<18x256xf32> to vector<256xf32>
    %81 = vector.shape_cast %80 : vector<256xf32> to vector<1x256xf32>
    %82 = arith.mulf %79, %75 : vector<18x256xf32>
    %cst_56 = arith.constant dense<0.000000e+00> : vector<256xf32>
    %83 = vector.multi_reduction <add>, %82, %cst_56 [0] : vector<18x256xf32> to vector<256xf32>
    %84 = vector.shape_cast %83 : vector<256xf32> to vector<1x256xf32>
    %cst_57 = arith.constant dense<0.000000e+00> : vector<1x32xf32>
    %85 = tpu.matmul %81, %3, %cst_57 {dimension_numbers = #tpu.dot_dimension_numbers<[1], [0], [0], [1], [0, 0, 1, 1], [], []>} : vector<1x256xf32>, vector<256x32xf32>, vector<1x32xf32> -> vector<1x32xf32>
    %cst_58 = arith.constant dense<0.000000e+00> : vector<1x32xf32>
    %86 = tpu.matmul %84, %3, %cst_58 {dimension_numbers = #tpu.dot_dimension_numbers<[1], [0], [0], [1], [0, 0, 1, 1], [], []>} : vector<1x256xf32>, vector<256x32xf32>, vector<1x32xf32> -> vector<1x32xf32>
    %cst_59 = arith.constant 7.812500e-03 : f32
    %87 = vector.broadcast %cst_59 : f32 to vector<1x32xf32>
    %88 = arith.mulf %85, %87 : vector<1x32xf32>
    %cst_60 = arith.constant 7.812500e-03 : f32
    %89 = vector.broadcast %cst_60 : f32 to vector<1x32xf32>
    %90 = arith.mulf %86, %89 : vector<1x32xf32>
    %91 = arith.mulf %88, %88 : vector<1x32xf32>
    %92 = arith.subf %90, %91 : vector<1x32xf32>
    %cst_61 = arith.constant 9.99999974E-6 : f32
    %93 = vector.broadcast %cst_61 : f32 to vector<1x32xf32>
    %94 = arith.addf %92, %93 : vector<1x32xf32>
    %95 = math.rsqrt %94 : vector<1x32xf32>
    %96 = arith.mulf %76, %95 : vector<1x32xf32>
    %97 = arith.mulf %88, %96 : vector<1x32xf32>
    %98 = arith.subf %77, %97 : vector<1x32xf32>
    %cst_62 = arith.constant dense<0.000000e+00> : vector<1x256xf32>
    %99 = tpu.matmul %96, %4, %cst_62 {dimension_numbers = #tpu.dot_dimension_numbers<[1], [0], [0], [1], [0, 0, 1, 1], [], []>} : vector<1x32xf32>, vector<32x256xf32>, vector<1x256xf32> -> vector<1x256xf32>
    %cst_63 = arith.constant dense<0.000000e+00> : vector<1x256xf32>
    %100 = tpu.matmul %98, %4, %cst_63 {dimension_numbers = #tpu.dot_dimension_numbers<[1], [0], [0], [1], [0, 0, 1, 1], [], []>} : vector<1x32xf32>, vector<32x256xf32>, vector<1x256xf32> -> vector<1x256xf32>
    %c1_64 = arith.constant 1 : index
    %c0_65 = arith.constant 0 : index
    %101 = vector.load %arg1[%c1_64, %c0_65] : memref<20x256xf32, #tpu.memory_space<vmem>>, vector<18x256xf32>
    %102 = vector.broadcast %99 : vector<1x256xf32> to vector<18x256xf32>
    %103 = arith.mulf %75, %102 : vector<18x256xf32>
    %104 = vector.broadcast %100 : vector<1x256xf32> to vector<18x256xf32>
    %105 = arith.addf %103, %104 : vector<18x256xf32>
    %106 = arith.addf %105, %101 : vector<18x256xf32>
    %cst_66 = arith.constant 0.000000e+00 : f32
    %107 = vector.broadcast %cst_66 : f32 to vector<18x256xf32>
    %108 = arith.maximumf %106, %107 : vector<18x256xf32>
    %c1_67 = arith.constant 1 : index
    %c0_68 = arith.constant 0 : index
    %109 = vector.load %arg7[%c1_67, %c0_68] : memref<20x256xf32, #tpu.memory_space<vmem>>, vector<18x256xf32>
    tpu.vector_store %arg7[%c1_67, %c0_68], %108 {strides = array<i32>} : memref<20x256xf32, #tpu.memory_space<vmem>>, vector<18x256xf32>,
    return
  }
  func.func @transform_0(%arg0: i32) -> (i32, i32) {
    %c0_i32 = arith.constant 0 : i32
    %c0_i32_0 = arith.constant 0 : i32
    %c0_i32_1 = arith.constant 0 : i32
    return %c0_i32, %c0_i32_0 : i32, i32
  }
  func.func @transform_1(%arg0: i32) -> (i32, i32) {
    %c0_i32 = arith.constant 0 : i32
    %c0_i32_0 = arith.constant 0 : i32
    %c0_i32_1 = arith.constant 0 : i32
    return %c0_i32, %c0_i32_0 : i32, i32
  }
  func.func @transform_2(%arg0: i32) -> (i32, i32) {
    %c0_i32 = arith.constant 0 : i32
    %c0_i32_0 = arith.constant 0 : i32
    %c0_i32_1 = arith.constant 0 : i32
    return %c0_i32, %c0_i32_0 : i32, i32
  }
  func.func @transform_3(%arg0: i32) -> (i32, i32) {
    %c0_i32 = arith.constant 0 : i32
    %c0_i32_0 = arith.constant 0 : i32
    %c0_i32_1 = arith.constant 0 : i32
    return %c0_i32, %c0_i32_0 : i32, i32
  }
  func.func @transform_4(%arg0: i32) -> (i32, i32) {
    %c0_i32 = arith.constant 0 : i32
    %c0_i32_0 = arith.constant 0 : i32
    %c0_i32_1 = arith.constant 0 : i32
    return %c0_i32, %c0_i32_0 : i32, i32
  }
  func.func @transform_5(%arg0: i32) -> (i32, i32) {
    %c0_i32 = arith.constant 0 : i32
    %c0_i32_0 = arith.constant 0 : i32
    %c0_i32_1 = arith.constant 0 : i32
    return %c0_i32, %c0_i32_0 : i32, i32
  }
  func.func @transform_6(%arg0: i32) -> (i32, i32) {
    %c0_i32 = arith.constant 0 : i32
    %c0_i32_0 = arith.constant 0 : i32
    %c0_i32_1 = arith.constant 0 : i32
    return %c0_i32, %c0_i32_0 : i32, i32
  }
}

</mosaic_0001>

<bundles_post_ra>
// kernel: resblock_forward.1
= control target key start
LH: loop header
LB: loop body
LE: loop exit
PB: predicated region body
PF: predicated region fallthrough
CT: control target
= control target key end

     0   :  { %11 = vsyncpa [#allocation5], 0  ;;  %s4450_s0 = inlined_call_operand.vmem [shape: f32[20,256], index: 0, kind: input, shape index: {}]   ;;  %s4451_s1 = inlined_call_operand.vmem [shape: bf16[768,256], index: 1, kind: input, shape index: {}]   ;;  %s4452_s2 = inlined_call_operand.hbm [shape: bf16[768,256], index: 2, kind: input, shape index: {}]   ;;  %s4453_s3 = inlined_call_operand.vmem [shape: f32[4,32], index: 3, kind: input, shape index: {}]   ;;  %s4454_s4 = inlined_call_operand.vmem [shape: f32[256,32], index: 4, kind: input, shape index: {}]   ;;  %s4455_s5 = inlined_call_operand.hbm [shape: f32[32,256], index: 5, kind: input, shape index: {}]   ;;  %s4456_s6 = inlined_call_operand.vmem [shape: f32[20,256], index: 6, kind: output, shape index: {}]  }
   0x1   :  { %12 = vsyncpa [#allocation7], 0  ;;  %s3456_s21 = smov [#allocation4]  }
   0x2   :  { %s22_s22 = sshll.u32 %s3456_s21, 4  ;;  %s23_s22 = int_to_ptr.vmem [resolvable:$true] %s22_s22 }
   0x3   :  { %s3420_s23 = scalar_lea.vmem %s23_s22, 12288  ;;  %p3425_p1 = scmp.lt.s32.totalorder %s23_s22, %s23_s22 }
   0x4   :  { %p3421_p0 = scmp.ne.s32.totalorder %s23_s22, %s3420_s23  ;;  %p3426_p2 = scmp.lt.s32.totalorder %s3420_s23, %s3420_s23 }
   0x6   :  { %p3427_p3 = por %p3426_p2, %p3425_p1 }
   0x8   :  { %p3428_p4 = pnand %p3427_p3, %p3421_p0 }
   0xa   :  { %3431 = shalt.err (!%p3428_p4)
}
   0xb   :  { %s3457_s24 = smov 128   ;;  %s3458_s25 = smov 8  }
   0xc   :  { %28 = dma.hbm_to_vmem [thread:$0]  %s4452_s2, 12288, %s23_s22, [#allocation5], %s3457_s24, %s3457_s24, %s3458_s25  }
   0xd   :  { %s3459_s28 = smov [#allocation6]  }
   0xe   :  { %s38_s29 = sshll.u32 %s3459_s28, 4  ;;  %s39_s29 = int_to_ptr.vmem [resolvable:$true] %s38_s29 }
   0xf   :  { %s3440_s30 = scalar_lea.vmem %s39_s29, 1024  ;;  %p3445_p6 = scmp.lt.s32.totalorder %s39_s29, %s39_s29 }
  0x10   :  { %p3441_p5 = scmp.ne.s32.totalorder %s39_s29, %s3440_s30  ;;  %p3446_p7 = scmp.lt.s32.totalorder %s3440_s30, %s3440_s30 }
  0x12   :  { %p3447_p8 = por %p3446_p7, %p3445_p6 }
  0x14   :  { %p3448_p9 = pnand %p3447_p8, %p3441_p5 }
  0x16   :  { %3451 = shalt.err (!%p3448_p9)
}
  0x17   :  { %s3460_s7 = smov 256   ;;  %s3461_s8 = smov 16  }
  0x18   :  { %44 = dma.hbm_to_vmem [thread:$0]  %s4455_s5, 1024, %s39_s29, [#allocation7], %s3460_s7, %s3460_s7, %s3461_s8  }
  0x19   :  { %3452 = dma.done.wait [#allocation5], 12288  }
  0x1a   :  { %3453 = vsyncadd [#allocation5], 4294955008 }
  0x1b   :  { %3454 = dma.done.wait [#allocation7], 1024  }
  0x1c   :  { %3455 = vsyncadd [#allocation7], 4294966272  ;;  %v3070_v0 = vld [vmem:[%s4451_s1 + $0x174] ss:$8 sps:$4 sm:$0xff]   ;;  %v3074_v2 = vld [vmem:[%s4451_s1 + $0x170] ss:$8 sps:$4 sm:$0xff]  }
  0x1d   :  { %v3072_v1 = vld [vmem:[%s4451_s1 + $0x74] ss:$8 sps:$4 sm:$0xff]   ;;  %422 = vmatprep.subr.bf16.mxu0 %v3070_v0  ;;  %v3075_v3 = vld [vmem:[%s4451_s1 + $0x70] ss:$8 sps:$4 sm:$0xff]   ;;  %v3076_v4 = vld [vmem:[%s4451_s1 + $0x164] ss:$8 sps:$4 sm:$0xff]  }
  0x1e   :  { %642 = vmatprep.subr.bf16.mxu1 %v3072_v1  ;;  %423 = vmatpush1.bf16.msra.mxu0 %v3074_v2  ;;  %v3078_v5 = vld [vmem:[%s4451_s1 + $0x64] ss:$8 sps:$4 sm:$0xff]   ;;  %v3080_v6 = vld [vmem:[%s4451_s1 + $0x160] ss:$8 sps:$4 sm:$0xff]   ;;  %v3082_v8 = vld [vmem:[%s4451_s1 + $0x154] ss:$8 sps:$4 sm:$0xff]  }
  0x1f   :  { %643 = vmatpush1.bf16.msra.mxu1 %v3075_v3  ;;  %424 = vmatprep.subr.bf16.mxu0 %v3076_v4  ;;  %v3081_v7 = vld [vmem:[%s4451_s1 + $0x60] ss:$8 sps:$4 sm:$0xff]   ;;  %v3084_v9 = vld [vmem:[%s4451_s1 + $0x54] ss:$8 sps:$4 sm:$0xff]   ;;  %v3086_v10 = vld [vmem:[%s4451_s1 + $0x150] ss:$8 sps:$4 sm:$0xff]  }
  0x20   :  { %644 = vmatprep.subr.bf16.mxu1 %v3078_v5  ;;  %v3087_v11 = vld [vmem:[%s4451_s1 + $0x50] ss:$8 sps:$4 sm:$0xff]   ;;  %v3088_v12 = vld [vmem:[%s4451_s1 + $0x144] ss:$8 sps:$4 sm:$0xff]   ;;  %v3092_v14 = vld [vmem:[%s4451_s1 + $0x140] ss:$8 sps:$4 sm:$0xff]  }
  0x21   :  { %v3090_v13 = vld [vmem:[%s4451_s1 + $0x44] ss:$8 sps:$4 sm:$0xff]   ;;  %v3093_v15 = vld [vmem:[%s4451_s1 + $0x40] ss:$8 sps:$4 sm:$0xff]   ;;  %v3094_v16 = vld [vmem:[%s4451_s1 + $0x134] ss:$8 sps:$4 sm:$0xff]  }
  0x22   :  { %425 = vmatpush1.bf16.msra.mxu0 %v3080_v6  ;;  %v3096_v17 = vld [vmem:[%s4451_s1 + $0x34] ss:$8 sps:$4 sm:$0xff]   ;;  %v3098_v18 = vld [vmem:[%s4451_s1 + $0x130] ss:$8 sps:$4 sm:$0xff]   ;;  %v3100_v20 = vld [vmem:[%s4451_s1 + $0x124] ss:$8 sps:$4 sm:$0xff]  }
  0x23   :  { %645 = vmatpush1.bf16.msra.mxu1 %v3081_v7  ;;  %426 = vmatprep.subr.bf16.mxu0 %v3082_v8  ;;  %v3099_v19 = vld [vmem:[%s4451_s1 + $0x30] ss:$8 sps:$4 sm:$0xff]   ;;  %v3102_v21 = vld [vmem:[%s4451_s1 + $0x24] ss:$8 sps:$4 sm:$0xff]   ;;  %v3104_v22 = vld [vmem:[%s4451_s1 + $0x120] ss:$8 sps:$4 sm:$0xff]  }
  0x24   :  { %646 = vmatprep.subr.bf16.mxu1 %v3084_v9  ;;  %v3105_v23 = vld [vmem:[%s4451_s1 + $0x20] ss:$8 sps:$4 sm:$0xff]   ;;  %v3106_v24 = vld [vmem:[%s4451_s1 + $0x114] ss:$8 sps:$4 sm:$0xff]   ;;  %v3110_v26 = vld [vmem:[%s4451_s1 + $0x110] ss:$8 sps:$4 sm:$0xff]  }
  0x25   :  { %v3108_v25 = vld [vmem:[%s4451_s1 + $0x14] ss:$8 sps:$4 sm:$0xff]   ;;  %v3111_v27 = vld [vmem:[%s4451_s1 + $0x10] ss:$8 sps:$4 sm:$0xff]   ;;  %v3112_v28 = vld [vmem:[%s4451_s1 + $0x104] ss:$8 sps:$4 sm:$0xff]  }
  0x26   :  { %427 = vmatpush1.bf16.msra.mxu0 %v3086_v10  ;;  %v3114_v29 = vld [vmem:[%s4451_s1 + $0x4] ss:$8 sps:$4 sm:$0xff]   ;;  %v3116_v30 = vld [vmem:[%s4451_s1 + $0x100] ss:$8 sps:$4 sm:$0xff]   ;;  %v3118_v32 = vld [vmem:[%s4451_s1 + $0x1f4] ss:$8 sps:$4 sm:$0xff]  }
  0x27   :  { %647 = vmatpush1.bf16.msra.mxu1 %v3087_v11  ;;  %428 = vmatprep.subr.bf16.mxu0 %v3088_v12  ;;  %v3117_v31 = vld [vmem:[%s4451_s1] ss:$8 sps:$4 sm:$0xff]   ;;  %v3120_v33 = vld [vmem:[%s4451_s1 + $0xf4] ss:$8 sps:$4 sm:$0xff]   ;;  %v3122_v34 = vld [vmem:[%s4451_s1 + $0x1f0] ss:$8 sps:$4 sm:$0xff]  }
  0x28   :  { %648 = vmatprep.subr.bf16.mxu1 %v3090_v13  ;;  %v3123_v35 = vld [vmem:[%s4451_s1 + $0xf0] ss:$8 sps:$4 sm:$0xff]   ;;  %v3124_v36 = vld [vmem:[%s4451_s1 + $0x1e4] ss:$8 sps:$4 sm:$0xff]   ;;  %v3128_v38 = vld [vmem:[%s4451_s1 + $0x1e0] ss:$8 sps:$4 sm:$0xff]  }
  0x29   :  { %v3126_v37 = vld [vmem:[%s4451_s1 + $0xe4] ss:$8 sps:$4 sm:$0xff]   ;;  %v3129_v39 = vld [vmem:[%s4451_s1 + $0xe0] ss:$8 sps:$4 sm:$0xff]   ;;  %v3130_v40 = vld [vmem:[%s4451_s1 + $0x1d4] ss:$8 sps:$4 sm:$0xff]  }
  0x2a   :  { %429 = vmatpush1.bf16.msra.mxu0 %v3092_v14  ;;  %v3132_v41 = vld [vmem:[%s4451_s1 + $0xd4] ss:$8 sps:$4 sm:$0xff]   ;;  %v3134_v42 = vld [vmem:[%s4451_s1 + $0x1d0] ss:$8 sps:$4 sm:$0xff]   ;;  %v3136_v44 = vld [vmem:[%s4451_s1 + $0x1c4] ss:$8 sps:$4 sm:$0xff]  }
  0x2b   :  { %649 = vmatpush1.bf16.msra.mxu1 %v3093_v15  ;;  %430 = vmatprep.subr.bf16.mxu0 %v3094_v16  ;;  %v3135_v43 = vld [vmem:[%s4451_s1 + $0xd0] ss:$8 sps:$4 sm:$0xff]   ;;  %v3138_v45 = vld [vmem:[%s4451_s1 + $0xc4] ss:$8 sps:$4 sm:$0xff]   ;;  %v3140_v46 = vld [vmem:[%s4451_s1 + $0x1c0] ss:$8 sps:$4 sm:$0xff]  }
  0x2c   :  { %650 = vmatprep.subr.bf16.mxu1 %v3096_v17  ;;  %v3141_v47 = vld [vmem:[%s4451_s1 + $0xc0] ss:$8 sps:$4 sm:$0xff]   ;;  %v54_v50 = vld [vmem:[%s4450_s0 + $0x10] sm:$0xff]  ;;  %v55_v51 = vld [vmem:[%s4450_s0 + $0x18] sm:$0xff]  ;;  %vm227_vm0 = vsmask.f32 7424 }
  0x2d   :  { %v52_v48 = vld [vmem:[%s4450_s0] sm:$0xff]  ;;  %v53_v49 = vld [vmem:[%s4450_s0 + $0x8] sm:$0xff]  ;;  %v3666_v55 = vpack.c.bf16 %v55_v51, %v54_v50  ;;  %v3142_v56 = vld [vmem:[%s4451_s1 + $0x1b4] ss:$8 sps:$4 sm:$0xff]   ;;  %vm731_vm1 = vcmask 1046528   ;;  %vm968_vm3 = vcmask 1041408  }
  0x2e   :  { %431 = vmatpush1.bf16.msra.mxu0 %v3098_v18  ;;  %v56_v52 = vld [vmem:[%s4450_s0 + $0x20] sm:$0xf]  ;;  %v57_v53 = vld [vmem:[%s4450_s0 + $0x28] sm:$0xf]  ;;  %v2917_v54 = vpack.c.bf16 %v53_v49, %v52_v48  ;;  %v3144_v57 = vld [vmem:[%s4451_s1 + $0xb4] ss:$8 sps:$4 sm:$0xff]   ;;  %v3410_v59 = vpack.c.bf16 %v55_v51, %v53_v49  ;;  %v3411_v63 = vpack.c.bf16 %v54_v50, %v52_v48 }
  0x2f   :  { %651 = vmatpush1.bf16.msra.mxu1 %v3099_v19  ;;  %432 = vmatprep.subr.bf16.mxu0 %v3100_v20  ;;  %v2919_v58 = vpack.c.bf16 %v57_v53, %v56_v52  ;;  %v3146_v60 = vld [vmem:[%s4451_s1 + $0x1b0] ss:$8 sps:$4 sm:$0xff]   ;;  %v3148_v62 = vld [vmem:[%s4451_s1 + $0x1a4] ss:$8 sps:$4 sm:$0xff]   ;;  %v3152_v2 = vld [vmem:[%s4451_s1 + $0x1a0] ss:$8 sps:$4 sm:$0xff]  }
  0x30   :  { %652 = vmatprep.subr.bf16.mxu1 %v3102_v21  ;;  %78 = vst [vmem:[#allocation2 + $0x10] sm:$0xff] %v2917_v54  ;;  %v3147_v61 = vld [vmem:[%s4451_s1 + $0xb0] ss:$8 sps:$4 sm:$0xff]   ;;  %v3150_v0 = vld [vmem:[%s4451_s1 + $0xa4] ss:$8 sps:$4 sm:$0xff]   ;;  %v243_v1 = vshll.u32 %v3410_v59, 16  ;;  %674 = vmatprep.mubr.bf16.mxu1 %v3410_v59 }
  0x31   :  { %80 = vst [vmem:[#allocation2 + $0x8] sm:$0x33] %v2919_v58  ;;  %v3153_v3 = vld [vmem:[%s4451_s1 + $0xa0] ss:$8 sps:$4 sm:$0xff]   ;;  %v3154_v4 = vld [vmem:[%s4451_s1 + $0x194] ss:$8 sps:$4 sm:$0xff]  }
  0x32   :  { %433 = vmatpush1.bf16.msra.mxu0 %v3104_v22  ;;  %v231_v5 = vshll.u32 %v3411_v63, 16  ;;  %v3156_v6 = vld [vmem:[%s4451_s1 + $0x94] ss:$8 sps:$4 sm:$0xff]   ;;  %v241_v7 = vshrl.u32 %v3410_v59, 16  ;;  %v245_v8 = vrot.slane %v243_v1, 1  ;;  %v229_v15 = vshrl.u32 %v3411_v63, 16 }
  0x33   :  { %653 = vmatpush1.bf16.msra.mxu1 %v3105_v23  ;;  %434 = vmatprep.subr.bf16.mxu0 %v3106_v24  ;;  %v3158_v9 = vld [vmem:[%s4451_s1 + $0x190] ss:$8 sps:$4 sm:$0xff]   ;;  %v3160_v14 = vld [vmem:[%s4451_s1 + $0x184] ss:$8 sps:$4 sm:$0xff]   ;;  %v3164_v21 = vld [vmem:[%s4451_s1 + $0x180] ss:$8 sps:$4 sm:$0xff]  }
  0x34   :  { %654 = vmatprep.subr.bf16.mxu1 %v3108_v25  ;;  %v3159_v11 = vld [vmem:[%s4451_s1 + $0x90] ss:$8 sps:$4 sm:$0xff]   ;;  %v233_v16 = vrot.slane %v231_v5, 1  ;;  %v3162_v17 = vld [vmem:[%s4451_s1 + $0x84] ss:$8 sps:$4 sm:$0xff]   ;;  %v246_v18 = vor.u32 %v245_v8, %v241_v7  ;;  %vm4462_vm4 = vcmask 261120  }
  0x35   :  { %v3165_v23 = vld [vmem:[%s4451_s1 + $0x80] ss:$8 sps:$4 sm:$0xff]   ;;  %v3182_v52 = vld [vmem:[%s4451_s1 + $0x234] ss:$8 sps:$4 sm:$0xff]   ;;  %v3180_v53 = vld [vmem:[%s4451_s1 + $0x230] ss:$8 sps:$4 sm:$0xff]  }
  0x36   :  { %435 = vmatpush1.bf16.msra.mxu0 %v3110_v26  ;;  %v234_v24 = vor.u32 %v233_v16, %v229_v15  ;;  %v3177_v51 = vld [vmem:[%s4451_s1 + $0x240] ss:$8 sps:$4 sm:$0xff]   ;;  %v3185_v54 = vld [vmem:[%s4451_s1 + $0x224] ss:$8 sps:$4 sm:$0xff]   ;;  %v3198_v1 = vld [vmem:[%s4451_s1 + $0x2d0] ss:$8 sps:$4 sm:$0xff]  }
  0x37   :  { %655 = vmatpush1.bf16.msra.mxu1 %v3111_v27  ;;  %436 = vmatprep.subr.bf16.mxu0 %v3112_v28  ;;  %v3170_v28 = vld [vmem:[%s4451_s1 + $0x274] ss:$8 sps:$4 sm:$0xff]   ;;  %v3191_v58 = vld [vmem:[%s4451_s1 + $0x204] ss:$8 sps:$4 sm:$0xff]   ;;  %v3189_v59 = vld [vmem:[%s4451_s1 + $0x200] ss:$8 sps:$4 sm:$0xff]  }
  0x38   :  { %656 = vmatprep.subr.bf16.mxu1 %v3114_v29  ;;  %v181_v10 = vld [vmem:[#allocation2 + $0x8] sm:$0x33]  ;;  %v3204_v5 = vld [vmem:[%s4451_s1 + $0x2b0] ss:$8 sps:$4 sm:$0xff]   ;;  %v3214_v8 = vld [vmem:[%s4451_s1 + $0x294] ss:$8 sps:$4 sm:$0xff]  }
  0x39   :  { %v3704_v12 = vcombine.high %v181_v10, %v181_v10  ;;  %v3706_v13 = vcombine.low %v181_v10, %v181_v10  ;;  %v3207_v7 = vld [vmem:[%s4451_s1 + $0x2a0] ss:$8 sps:$4 sm:$0xff]   ;;  %v3217_v10 = vld [vmem:[%s4451_s1 + $0x284] ss:$8 sps:$4 sm:$0xff]   ;;  %v3844_v15 = vld [vmem:[%s4454_s4 + $0x78] sm:$0xff]  ;;  %vm4463_vm5 = vcmask 1040384  }
  0x3a   :  { %437 = vmatpush1.bf16.msra.mxu0 %v3116_v30  ;;  %v3168_v30 = vld [vmem:[%s4451_s1 + $0x270] ss:$8 sps:$4 sm:$0xff]   ;;  %vm1349_vm6 = vsmask.f32 256  ;;  %vm1351_vm7 = vcmask 1044484   ;;  %vm1358_vm12 = vcmask 1041409  }
  0x3b   :  { %657 = vmatpush1.bf16.msra.mxu1 %v3117_v31  ;;  %438 = vmatprep.subr.bf16.mxu0 %v3118_v32  ;;  %v248_v19 = vshll.u32 %v3704_v12, 16  ;;  %v236_v20 = vshll.u32 %v3706_v13, 16  ;;  %v255_v26 = vshrl.u32 %v3704_v12, 16  ;;  %v148_v32 = vld [vmem:[#allocation2 + $0x8] sm:$0x11]  ;;  %v3849_v16 = vld [vmem:[%s4454_s4 + $0xf0] sm:$0xff]  ;;  %vm1350_vm9 = vmand %vm4463_vm5, %vm1349_vm6 }
  0x3c   :  { %658 = vmatprep.subr.bf16.mxu1 %v3120_v33  ;;  %v3173_v33 = vld [vmem:[%s4451_s1 + $0x264] ss:$8 sps:$4 sm:$0xff]   ;;  %v2738_v48 = vcombine.low %v148_v32, %v148_v32  ;;  %vm1352_vm8 = vsmask.f32 4352  ;;  %vm1359_vm13 = vsmask.f32 7942 }
  0x3d   :  { %v250_v22 = vrot.slane %v248_v19, 1  ;;  %v238_v25 = vrot.slane %v236_v20, 1  ;;  %v3881_v19 = vld [vmem:[%s4454_s4 + $0x60] sm:$0xff]  ;;  %v3887_v20 = vld [vmem:[%s4454_s4 + $0xd8] sm:$0xff]  ;;  %vm1353_vm10 = vmand %vm1351_vm7, %vm1352_vm8  ;;  %vm1361_vm14 = vcmask 1045509   ;;  %vm1418_vm7 = vcmask 1047556  }
  0x3e   :  { %439 = vmatpush2.bf16.msra.mxu0 %v3122_v34  ;;  %v2739_v34 = vcombine.high %v148_v32, %v148_v32  ;;  %v3954_v32 = vld [vmem:[%s4454_s4 + $0x30] sm:$0xff]  ;;  %vm1354_vm11 = vmor %vm1353_vm10, %vm1350_vm9  ;;  %vm1362_vm15 = vsmask.f32 7958  ;;  %vm1419_vm8 = vsmask.f32 7954 }
  0x3f   :  { %659 = vmatpush2.bf16.msra.mxu1 %v3123_v35  ;;  %440 = vmatprep.subr.bf16.mxu0 %v3124_v36  ;;  %v251_v27 = vsel %vm227_vm0, %v246_v18, %v250_v22  ;;  %v239_v29 = vsel %vm227_vm0, %v234_v24, %v238_v25  ;;  %v257_v31 = vor.u32 %v255_v26, %v250_v22  ;;  %v3171_v35 = vld [vmem:[%s4451_s1 + $0x260] ss:$8 sps:$4 sm:$0xff]   ;;  %v3176_v36 = vld [vmem:[%s4451_s1 + $0x254] ss:$8 sps:$4 sm:$0xff]   ;;  %v4457_v24 = vmov 0.0   ;;  %vm4164_vm10 = vmand %vm1418_vm7, %vm1419_vm8 }
  0x40   :  { %660 = vmatprep.subr.bf16.mxu1 %v3126_v37  ;;  %454 = vmatprep.mubr.bf16.mxu0 %v251_v27  ;;  %v252_v37 = vshrl.u32 %v3706_v13, 16  ;;  %v3875_v18 = vld [vmem:[%s4454_s4 + $0xe0] sm:$0xff]  ;;  %v3899_v22 = vld [vmem:[%s4454_s4 + $0xd0] sm:$0xff]  ;;  %v3918_v26 = vld [vmem:[%s4454_s4 + $0x48] sm:$0xff] }
  0x41   :  { %v3924_v27 = vld [vmem:[%s4454_s4 + $0xc0] sm:$0xff] }
  0x42   :  { %441 = vmatpush2.bf16.msra.mxu0 %v3128_v38  ;;  %v693_v38 = vld [vmem:[#allocation2 + $0x10] sm:$0xee] }
  0x43   :  { %661 = vmatpush2.bf16.msra.mxu1 %v3129_v39  ;;  %442 = vmatprep.subr.bf16.mxu0 %v3130_v40  ;;  %v2772_v39 = vcombine.low %v693_v38, %v3666_v55  ;;  %v2773_v40 = vcombine.high %v693_v38, %v3666_v55  ;;  %v3183_v55 = vld [vmem:[%s4451_s1 + $0x220] ss:$8 sps:$4 sm:$0xff]   ;;  %v3990_v38 = vld [vmem:[%s4454_s4 + $0x18] sm:$0xff] }
  0x44   :  { %662 = vmatprep.subr.bf16.mxu1 %v3132_v41  ;;  %v733_v41 = vrot.slane %v3706_v13, 1  ;;  %v3863_v13 = vld [vmem:[%s4454_s4 + $0xe8] sm:$0xff] }
  0x46   :  { %443 = vmatpush2.bf16.msra.mxu0 %v3134_v42  ;;  %v736_v42 = vrot.slane %v3704_v12, 1  ;;  %v3855_v12 = vld [vmem:[%s4454_s4 + $0x70] sm:$0xff] }
  0x47   :  { %663 = vmatpush2.bf16.msra.mxu1 %v3135_v43  ;;  %444 = vmatprep.subr.bf16.mxu0 %v3136_v44  ;;  %v3174_v43 = vld [vmem:[%s4451_s1 + $0x250] ss:$8 sps:$4 sm:$0xff]   ;;  %v732_v44 = vrot.slane %v2772_v39, 1 }
  0x48   :  { %664 = vmatprep.subr.bf16.mxu1 %v3138_v45  ;;  %v735_v45 = vrot.slane %v2773_v40, 1  ;;  %v3996_v39 = vld [vmem:[%s4454_s4 + $0x90] sm:$0xff] }
  0x49   :  { %v734_v49 = vsel %vm731_vm1, %v732_v44, %v733_v41  ;;  %v4001_v40 = vld [vmem:[%s4454_s4 + $0x10] sm:$0xff]  ;;  %v4024_v44 = vld [vmem:[%s4454_s4] sm:$0xff] }
  0x4a   :  { %445 = vmatpush2.bf16.msra.mxu0 %v3140_v46  ;;  %v3179_v46 = vld [vmem:[%s4451_s1 + $0x244] ss:$8 sps:$4 sm:$0xff]   ;;  %v737_v50 = vsel %vm731_vm1, %v735_v45, %v736_v42 }
  0x4b   :  { %665 = vmatpush2.bf16.msra.mxu1 %v3141_v47  ;;  %446 = vmatprep.subr.bf16.mxu0 %v3142_v56  ;;  %v254_v47 = vor.u32 %v252_v37, %v238_v25  ;;  %v3188_v56 = vld [vmem:[%s4451_s1 + $0x214] ss:$8 sps:$4 sm:$0xff]   ;;  %v3912_v25 = vld [vmem:[%s4454_s4 + $0xc8] sm:$0xff] }
  0x4c   :  { %666 = vmatprep.subr.bf16.mxu1 %v3144_v57  ;;  %v3186_v57 = vld [vmem:[%s4451_s1 + $0x210] ss:$8 sps:$4 sm:$0xff]  }
  0x4d   :  { %v3984_v37 = vld [vmem:[%s4454_s4 + $0x98] sm:$0xff] }
  0x4e   :  { %447 = vmatpush2.bf16.msra.mxu0 %v3146_v60  ;;  %v3194_v60 = vld [vmem:[%s4451_s1 + $0x2f4] ss:$8 sps:$4 sm:$0xff]  }
  0x4f   :  { %667 = vmatpush2.bf16.msra.mxu1 %v3147_v61  ;;  %448 = vmatprep.subr.bf16.mxu0 %v3148_v62  ;;  %v3192_v61 = vld [vmem:[%s4451_s1 + $0x2f0] ss:$8 sps:$4 sm:$0xff]   ;;  %v3197_v62 = vld [vmem:[%s4451_s1 + $0x2e4] ss:$8 sps:$4 sm:$0xff]  }
  0x50   :  { %668 = vmatprep.subr.bf16.mxu1 %v3150_v0  ;;  %v3200_v0 = vld [vmem:[%s4451_s1 + $0x2d4] ss:$8 sps:$4 sm:$0xff]  }
  0x52   :  { %449 = vmatpush2.bf16.msra.mxu0 %v3152_v2  ;;  %v3203_v2 = vld [vmem:[%s4451_s1 + $0x2c4] ss:$8 sps:$4 sm:$0xff]  }
  0x53   :  { %669 = vmatpush2.bf16.msra.mxu1 %v3153_v3  ;;  %450 = vmatprep.subr.bf16.mxu0 %v3154_v4  ;;  %v3201_v3 = vld [vmem:[%s4451_s1 + $0x2c0] ss:$8 sps:$4 sm:$0xff]   ;;  %v3206_v4 = vld [vmem:[%s4451_s1 + $0x2b4] ss:$8 sps:$4 sm:$0xff]  }
  0x54   :  { %670 = vmatprep.subr.bf16.mxu1 %v3156_v6  ;;  %v3209_v6 = vld [vmem:[%s4451_s1 + $0x2a4] ss:$8 sps:$4 sm:$0xff]  }
  0x56   :  { %451 = vmatpush2.bf16.msra.mxu0 %v3158_v9  ;;  %v3212_v9 = vld [vmem:[%s4451_s1 + $0x290] ss:$8 sps:$4 sm:$0xff]  }
  0x57   :  { %671 = vmatpush2.bf16.msra.mxu1 %v3159_v11  ;;  %452 = vmatprep.subr.bf16.mxu0 %v3160_v14  ;;  %v3215_v11 = vld [vmem:[%s4451_s1 + $0x280] ss:$8 sps:$4 sm:$0xff]   ;;  %v3839_v14 = vld [vmem:[%s4454_s4 + $0xf8] sm:$0xff] }
  0x58   :  { %672 = vmatprep.subr.bf16.mxu1 %v3162_v17  ;;  %v3869_v17 = vld [vmem:[%s4454_s4 + $0x68] sm:$0xff] }
  0x5a   :  { %453 = vmatpush2.bf16.msra.mxu0 %v3164_v21  ;;  %v3893_v21 = vld [vmem:[%s4454_s4 + $0x58] sm:$0xff] }
  0x5b   :  { %673 = vmatpush2.bf16.msra.mxu1 %v3165_v23  ;;  %902 = vmatprep.subr.bf16.mxu0 %v3170_v28  ;;  %v3905_v23 = vld [vmem:[%s4454_s4 + $0x50] sm:$0xff]  ;;  %v3930_v28 = vld [vmem:[%s4454_s4 + $0x40] sm:$0xff] }
  0x5c   :  { %2923 = vmatprep.subr.mxu1 %v3839_v14 }
  0x5d   :  { %455 = vmatmul.mubr.bf16.vlgmr.msra.gmra.mxu0 %v239_v29  ;;  %v3936_v29 = vld [vmem:[%s4454_s4 + $0xb8] sm:$0xff] }
  0x5e   :  { %675 = vmatmul.mubr.bf16.vlgmr.msra.gmra.mxu1 %v3411_v63  ;;  %903 = vmatpush1.bf16.msra.mxu0 %v3168_v30  ;;  %v3195_v63 = vld [vmem:[%s4451_s1 + $0x2e0] ss:$8 sps:$4 sm:$0xff]   ;;  %v3942_v30 = vld [vmem:[%s4454_s4 + $0x38] sm:$0xff] }
  0x5f   :  { %464 = vmatprep.mubr.bf16.mxu0 %v257_v31  ;;  %904 = vmatprep.subr.bf16.mxu0 %v3173_v33  ;;  %v3948_v31 = vld [vmem:[%s4454_s4 + $0xb0] sm:$0xff]  ;;  %v3960_v33 = vld [vmem:[%s4454_s4 + $0xa8] sm:$0xff] }
  0x60   :  { %684 = vmatprep.mubr.bf16.mxu1 %v2739_v34  ;;  %2924 = vmatpush3.msra.mxu1 %v3844_v15  ;;  %v3966_v34 = vld [vmem:[%s4454_s4 + $0x28] sm:$0xff] }
  0x61   :  { %2925 = vmatprep.subr.mxu1 %v3849_v16 }
  0x62   :  { %905 = vmatpush1.bf16.msra.mxu0 %v3171_v35  ;;  %2926 = vmatpush3.msra.mxu1 %v3855_v12  ;;  %v3972_v35 = vld [vmem:[%s4454_s4 + $0xa0] sm:$0xff] }
  0x63   :  { %906 = vmatprep.subr.bf16.mxu0 %v3176_v36  ;;  %2927 = vmatprep.subr.mxu1 %v3863_v13  ;;  %v3978_v36 = vld [vmem:[%s4454_s4 + $0x20] sm:$0xff] }
  0x64   :  { %2928 = vmatpush3.msra.mxu1 %v3869_v17 }
  0x65   :  { %465 = vmatmul.mubr.bf16.gmra.mxu0 %v254_v47  ;;  %2929 = vmatprep.subr.mxu1 %v3875_v18 }
  0x66   :  { %685 = vmatmul.mubr.bf16.gmra.mxu1 %v2738_v48  ;;  %907 = vmatpush1.bf16.msra.mxu0 %v3174_v43  ;;  %v4018_v43 = vld [vmem:[%s4454_s4 + $0x80] sm:$0xff] }
  0x67   :  { %934 = vmatprep.mubr.bf16.mxu0 %v737_v50  ;;  %908 = vmatprep.subr.bf16.mxu0 %v3179_v46 }
  0x68   :  { %2930 = vmatpush3.msra.mxu1 %v3881_v19 }
  0x69   :  { %2931 = vmatprep.subr.mxu1 %v3887_v20 }
  0x6a   :  { %909 = vmatpush1.bf16.msra.mxu0 %v3177_v51  ;;  %2932 = vmatpush3.msra.mxu1 %v3893_v21 }
  0x6b   :  { %910 = vmatprep.subr.bf16.mxu0 %v3182_v52  ;;  %2933 = vmatprep.subr.mxu1 %v3899_v22 }
  0x6c   :  { %2934 = vmatpush3.msra.mxu1 %v3905_v23 }
  0x6d   :  { %2935 = vmatprep.subr.mxu1 %v3912_v25 }
  0x6e   :  { %911 = vmatpush1.bf16.msra.mxu0 %v3180_v53  ;;  %2936 = vmatpush3.msra.mxu1 %v3918_v26 }
  0x6f   :  { %912 = vmatprep.subr.bf16.mxu0 %v3185_v54  ;;  %2937 = vmatprep.subr.mxu1 %v3924_v27 }
  0x70   :  { %2938 = vmatpush3.msra.mxu1 %v3930_v28 }
  0x71   :  { %2939 = vmatprep.subr.mxu1 %v3936_v29 }
  0x72   :  { %913 = vmatpush1.bf16.msra.mxu0 %v3183_v55  ;;  %2940 = vmatpush3.msra.mxu1 %v3942_v30 }
  0x73   :  { %914 = vmatprep.subr.bf16.mxu0 %v3188_v56  ;;  %2941 = vmatprep.subr.mxu1 %v3948_v31 }
  0x74   :  { %2942 = vmatpush3.msra.mxu1 %v3954_v32 }
  0x75   :  { %2943 = vmatprep.subr.mxu1 %v3960_v33 }
  0x76   :  { %915 = vmatpush1.bf16.msra.mxu0 %v3186_v57  ;;  %2944 = vmatpush3.msra.mxu1 %v3966_v34 }
  0x77   :  { %916 = vmatprep.subr.bf16.mxu0 %v3191_v58  ;;  %2945 = vmatprep.subr.mxu1 %v3972_v35 }
  0x78   :  { %2946 = vmatpush3.msra.mxu1 %v3978_v36 }
  0x79   :  { %2947 = vmatprep.subr.mxu1 %v3984_v37 }
  0x7a   :  { %917 = vmatpush1.bf16.msra.mxu0 %v3189_v59  ;;  %2948 = vmatpush3.msra.mxu1 %v3990_v38 }
  0x7b   :  { %918 = vmatprep.subr.bf16.mxu0 %v3194_v60  ;;  %2949 = vmatprep.subr.mxu1 %v3996_v39 }
  0x7c   :  { %2950 = vmatpush3.msra.mxu1 %v4001_v40 }
  0x7e   :  { %919 = vmatpush2.bf16.msra.mxu0 %v3192_v61 }
  0x7f   :  { %920 = vmatprep.subr.bf16.mxu0 %v3197_v62 }
  0x82   :  { %921 = vmatpush2.bf16.msra.mxu0 %v3195_v63 }
  0x83   :  { %922 = vmatprep.subr.bf16.mxu0 %v3200_v0 }
  0x86   :  { %923 = vmatpush2.bf16.msra.mxu0 %v3198_v1 }
  0x87   :  { %924 = vmatprep.subr.bf16.mxu0 %v3203_v2  ;;  %v121_v2 = vlaneseq }
  0x8a   :  { %925 = vmatpush2.bf16.msra.mxu0 %v3201_v3  ;;  %v4030_v3 = vshrl.u32 %v121_v2, 7 }
  0x8b   :  { %926 = vmatprep.subr.bf16.mxu0 %v3206_v4 }
  0x8c   :  { %v123_v4 = vadd.s32 8, %v4030_v3 }
  0x8e   :  { %927 = vmatpush2.bf16.msra.mxu0 %v3204_v5  ;;  %vm132_vm2 = vcmp.ge.s32.totalorder %v123_v4, 10 }
  0x8f   :  { %928 = vmatprep.subr.bf16.mxu0 %v3209_v6 }
  0x92   :  { %929 = vmatpush2.bf16.msra.mxu0 %v3207_v7  ;;  %v4034_v7 = vsel %vm132_vm2, 1.0, %v4457_v24  ;;  %vm1360_vm2 = vmand %vm1358_vm12, %vm1359_vm13  ;;  %vm1429_vm12 = vcmask 1045508   ;;  %vm1430_vm13 = vsmask.f32 5376 }
  0x93   :  { %930 = vmatprep.subr.bf16.mxu0 %v3214_v8  ;;  %4464 = vst [vmem:[#allocation10_spill] sm:$0xff] %v4034_v7 }
  0x96   :  { %931 = vmatpush2.bf16.msra.mxu0 %v3212_v9 }
  0x97   :  { %932 = vmatprep.subr.bf16.mxu0 %v3217_v10 }
  0x9a   :  { %933 = vmatpush2.bf16.msra.mxu0 %v3215_v11 }
  0x9d   :  { %935 = vmatmul.mubr.bf16.vlgmr.msra.gmra.mxu0 %v734_v49 }
  0x9e   :  { %944 = vmatprep.mubr.bf16.mxu0 %v736_v42  ;;  %v4012_v42 = vld [vmem:[%s4454_s4 + $0x8] sm:$0xff] }
  0xa5   :  { %945 = vmatmul.mubr.bf16.gmra.mxu0 %v733_v41  ;;  %v4006_v41 = vld [vmem:[%s4454_s4 + $0x88] sm:$0xff] }
  0xa6   :  { %1301 = vmatprep.mubr.f32.mxu0 %v4457_v24  ;;  %2951 = vmatprep.subr.mxu1 %v4006_v41 }
  0xa7   :  { %2952 = vmatpush3.msra.mxu1 %v4012_v42 }
  0xa8   :  { %2953 = vmatprep.subr.mxu1 %v4018_v43 }
  0xa9   :  { %2954 = vmatpush3.msra.mxu1 %v4024_v44 }
  0xaa   :  { %2958 = vmatprep.subr.mxu1 %v3839_v14 }
 0x11d   :  { %v456_v45 = vpop.f32.mrf.mxu0 }
 0x11e   :  { %v676_v46 = vpop.f32.mrf.mxu1 }
 0x11f   :  { %v677_v47 = vadd.f32 %v676_v46, %v456_v45  ;;  %v458_v48 = vpop.f32.mrf.mxu0 }
 0x120   :  { %v678_v49 = vpop.f32.mrf.mxu1 }
 0x121   :  { %v679_v50 = vadd.f32 %v678_v49, %v458_v48  ;;  %v460_v51 = vpop.f32.mrf.mxu0 }
 0x122   :  { %v680_v52 = vpop.f32.mrf.mxu1 }
 0x123   :  { %v681_v53 = vadd.f32 %v680_v52, %v460_v51  ;;  %v462_v54 = vpop.f32.mrf.mxu0 }
 0x124   :  { %v682_v55 = vpop.f32.mrf.mxu1 }
 0x125   :  { %v683_v56 = vadd.f32 %v682_v55, %v462_v54  ;;  %v466_v57 = vpop.f32.mrf.mxu0 }
 0x126   :  { %v686_v58 = vpop.f32.mrf.mxu1 }
 0x127   :  { %v687_v59 = vadd.f32 %v686_v58, %v466_v57  ;;  %v468_v60 = vpop.f32.mrf.mxu0 }
 0x128   :  { %v688_v61 = vpop.f32.mrf.mxu1 }
 0x129   :  { %v470_v62 = vpop.f32.mrf.mxu0 }
 0x12a   :  { %v690_v63 = vpop.f32.mrf.mxu1 }
 0x12b   :  { %v471_v0 = vpop.f32.mrf.mxu0 }
 0x12c   :  { %v691_v1 = vpop.f32.mrf.mxu1 }
 0x15d   :  { %v936_v5 = vpop.f32.mrf.mxu0 }
 0x15e   :  { %v4038_v11 = vadd.f32 %v936_v5, %v677_v47 }
 0x15f   :  { %v938_v6 = vpop.f32.mrf.mxu0 }
 0x160   :  { %v4040_v45 = vadd.f32 %v938_v6, %v679_v50 }
 0x161   :  { %v940_v8 = vpop.f32.mrf.mxu0 }
 0x162   :  { %v4036_v9 = vadd.f32 %v940_v8, %v681_v53  ;;  %v689_v53 = vadd.f32 %v688_v61, %v468_v60  ;;  %v987_v47 = vmul.f32 %v4040_v45, %v4040_v45 }
 0x163   :  { %v942_v10 = vpop.f32.mrf.mxu0 }
 0x164   :  { %v963_v46 = vmul.f32 %v4034_v7, %v4036_v9  ;;  %v4044_v48 = vadd.f32 %v942_v10, %v683_v56 }
 0x165   :  { %v946_v49 = vpop.f32.mrf.mxu0 }
 0x166   :  { %v967_v51 = vadd.f32 %v963_v46, %v4038_v11  ;;  %v964_v52 = vmul.f32 %v4034_v7, %v4044_v48  ;;  %v4049_v54 = vadd.f32 %v946_v49, %v687_v59 }
 0x167   :  { %v948_v55 = vpop.f32.mrf.mxu0 }
 0x168   :  { %v977_v50 = vadd.f32 %v964_v52, %v4040_v45  ;;  %v989_v57 = vmul.f32 %v964_v52, %v4044_v48  ;;  %v969_v56 = vsel %vm968_vm3, %v4049_v54, 0.0  ;;  %v4057_v62 = vadd.f32 %v948_v55, %v689_v53 }
 0x169   :  { %v970_v58 = vadd.f32 %v969_v56, %v967_v51  ;;  %v950_v63 = vpop.f32.mrf.mxu0 }
 0x16a   :  { %4465 = vst [vmem:[#allocation11_spill] sm:$0xff] %v4057_v62  ;;  %v1001_v0 = vadd.f32 %v989_v57, %v987_v47  ;;  %v978_v59 = vsel %vm968_vm3, %v4057_v62, 0.0  ;;  %v991_v60 = vmul.f32 %v4057_v62, %v4057_v62 }
 0x16b   :  { %v971_v1 = vrot.slane %v970_v58, 4  ;;  %v951_v61 = vpop.f32.mrf.mxu0  ;;  %v979_v2 = vadd.f32 %v978_v59, %v977_v50  ;;  %v988_v50 = vmul.f32 %v963_v46, %v4036_v9  ;;  %v986_v59 = vmul.f32 %v4038_v11, %v4038_v11 }
 0x16c   :  { %v1002_v5 = vsel %vm968_vm3, %v991_v60, 0.0 }
 0x16d   :  { %v972_v4 = vadd.f32 %v971_v1, %v970_v58  ;;  %v980_v6 = vrot.slane %v979_v2, 4  ;;  %v1003_v8 = vadd.f32 %v1002_v5, %v1001_v0  ;;  %v990_v1 = vmul.f32 %v4049_v54, %v4049_v54 }
 0x16e   :  { %v992_v60 = vadd.f32 %v988_v50, %v986_v59 }
 0x16f   :  { %v973_v10 = vrot.slane %v972_v4, 2  ;;  %v981_v49 = vadd.f32 %v980_v6, %v979_v2  ;;  %v1004_v51 = vrot.slane %v1003_v8, 4  ;;  %v993_v61 = vsel %vm968_vm3, %v990_v1, 0.0 }
 0x170   :  { %v4466_v6 = vmov 0.0  }
 0x171   :  { %v974_v52 = vadd.f32 %v973_v10, %v972_v4  ;;  %v982_v53 = vrot.slane %v981_v49, 2  ;;  %v1005_v55 = vadd.f32 %v1004_v51, %v1003_v8  ;;  %v4102_v8 = vld [vmem:[#allocation6 + $0x38] sm:$0xff]  ;;  %v4104_v10 = vld [vmem:[#allocation6 + $0x30] sm:$0xff]  ;;  %v4110_v51 = vld [vmem:[#allocation6 + $0x20] sm:$0xff] }
 0x172   :  { %1261 = vmatprep.subr.mxu0 %v4102_v8 }
 0x173   :  { %v983_v47 = vadd.f32 %v982_v53, %v981_v49  ;;  %v1006_v57 = vrot.slane %v1005_v55, 2  ;;  %v975_v56 = vrot.slane %v974_v52, 1  ;;  %v4106_v49 = vld [vmem:[#allocation6 + $0x28] sm:$0xff]  ;;  %1262 = vmatpush1.msra.mxu0 %v4104_v10  ;;  %v4118_v53 = vld [vmem:[#allocation6 + $0x10] sm:$0xff] }
 0x174   :  { %1263 = vmatprep.subr.mxu0 %v4106_v49 }
 0x175   :  { %v984_v63 = vrot.slane %v983_v47, 1  ;;  %v1007_v24 = vadd.f32 %v1006_v57, %v1005_v55  ;;  %v976_v58 = vadd.f32 %v975_v56, %v974_v52  ;;  %v4114_v52 = vld [vmem:[#allocation6 + $0x18] sm:$0xff]  ;;  %1264 = vmatpush1.msra.mxu0 %v4110_v51  ;;  %v4122_v55 = vld [vmem:[#allocation6 + $0x8] sm:$0xff] }
 0x176   :  { %1265 = vmatprep.subr.mxu0 %v4114_v52  ;;  %v3220_v57 = vld [vmem:[#allocation4 + $0x74] ss:$8 sps:$4 sm:$0xff]  }
 0x177   :  { %v985_v7 = vadd.f32 %v984_v63, %v983_v47  ;;  %v1008_v62 = vrot.slane %v1007_v24, 1  ;;  %v4126_v47 = vld [vmem:[#allocation6] sm:$0xff]  ;;  %1266 = vmatpush1.msra.mxu0 %v4118_v53  ;;  %v3226_v56 = vld [vmem:[#allocation4 + $0x174] ss:$8 sps:$4 sm:$0xff]  }
 0x178   :  { %1267 = vmatprep.subr.mxu0 %v4122_v55 }
 0x179   :  { %1074 = vmatprep.mubr.f32.mxu1 %v985_v7  ;;  %v1009_v0 = vadd.f32 %v1008_v62, %v1007_v24  ;;  %v994_v7 = vadd.f32 %v993_v61, %v992_v60  ;;  %1268 = vmatpush1.msra.mxu0 %v4126_v47 }
 0x17a   :  { %1075 = vmatmul.mubr.f32.vlgmr.msra.gmra.mxu1 %v976_v58  ;;  %1931 = vmatprep.subr.bf16.mxu0 %v3220_v57  ;;  %v3232_v57 = vld [vmem:[#allocation4 + $0x164] ss:$8 sps:$4 sm:$0xff]  }
 0x17b   :  { %2959 = vmatpush3.msra.mxu1 %v3844_v15  ;;  %1144 = vmatprep.mubr.f32.mxu1 %v1009_v0  ;;  %v995_v24 = vrot.slane %v994_v7, 4 }
 0x17c   :  { %2960 = vmatprep.subr.mxu1 %v3849_v16 }
 0x17d   :  { %2961 = vmatpush3.msra.mxu1 %v3855_v12  ;;  %v996_v46 = vadd.f32 %v995_v24, %v994_v7 }
 0x17e   :  { %2962 = vmatprep.subr.mxu1 %v3863_v13 }
 0x17f   :  { %2963 = vmatpush3.msra.mxu1 %v3869_v17  ;;  %v997_v62 = vrot.slane %v996_v46, 2 }
 0x180   :  { %2964 = vmatprep.subr.mxu1 %v3875_v18 }
 0x181   :  { %2965 = vmatpush3.msra.mxu1 %v3881_v19  ;;  %v998_v2 = vadd.f32 %v997_v62, %v996_v46  ;;  %v959_v62 = vld [vmem:[%s4453_s3] sm:$0x1] }
 0x182   :  { %2966 = vmatprep.subr.mxu1 %v3887_v20 }
 0x183   :  { %2967 = vmatpush3.msra.mxu1 %v3893_v21  ;;  %v999_v4 = vrot.slane %v998_v2, 1 }
 0x184   :  { %2968 = vmatprep.subr.mxu1 %v3899_v22 }
 0x185   :  { %2969 = vmatpush3.msra.mxu1 %v3905_v23  ;;  %v1000_v5 = vadd.f32 %v999_v4, %v998_v2  ;;  %v3224_v4 = vld [vmem:[#allocation4 + $0x170] ss:$8 sps:$4 sm:$0xff]  }
 0x186   :  { %2970 = vmatprep.subr.mxu1 %v3912_v25 }
 0x187   :  { %2971 = vmatpush3.msra.mxu1 %v3918_v26 }
 0x188   :  { %2972 = vmatprep.subr.mxu1 %v3924_v27 }
 0x189   :  { %2973 = vmatpush3.msra.mxu1 %v3930_v28 }
 0x18a   :  { %2974 = vmatprep.subr.mxu1 %v3936_v29 }
 0x18b   :  { %2975 = vmatpush3.msra.mxu1 %v3942_v30 }
 0x18c   :  { %2976 = vmatprep.subr.mxu1 %v3948_v31 }
 0x18d   :  { %2977 = vmatpush3.msra.mxu1 %v3954_v32 }
 0x18e   :  { %2978 = vmatprep.subr.mxu1 %v3960_v33 }
 0x18f   :  { %2979 = vmatpush3.msra.mxu1 %v3966_v34 }
 0x190   :  { %2980 = vmatprep.subr.mxu1 %v3972_v35 }
 0x191   :  { %2981 = vmatpush3.msra.mxu1 %v3978_v36 }
 0x192   :  { %2982 = vmatprep.subr.mxu1 %v3984_v37 }
 0x193   :  { %2983 = vmatpush3.msra.mxu1 %v3990_v38 }
 0x194   :  { %2984 = vmatprep.subr.mxu1 %v3996_v39 }
 0x195   :  { %2985 = vmatpush3.msra.mxu1 %v4001_v40 }
 0x196   :  { %2986 = vmatprep.subr.mxu1 %v4006_v41 }
 0x197   :  { %2987 = vmatpush3.msra.mxu1 %v4012_v42 }
 0x198   :  { %2988 = vmatprep.subr.mxu1 %v4018_v43 }
 0x199   :  { %2989 = vmatpush3.msra.mxu1 %v4024_v44 }
 0x19a   :  { %1145 = vmatmul.mubr.f32.vlgmr.msra.gmra.mxu1 %v1000_v5  ;;  %1187 = vmatprep.subr.mxu1 %v4102_v8 }
 0x19b   :  { %1227 = vmatprep.mubr.f32.mxu1 %v4466_v6  ;;  %1188 = vmatpush1.msra.mxu1 %v4104_v10 }
 0x19c   :  { %1189 = vmatprep.subr.mxu1 %v4106_v49 }
 0x19d   :  { %1190 = vmatpush1.msra.mxu1 %v4110_v51 }
 0x19e   :  { %1191 = vmatprep.subr.mxu1 %v4114_v52 }
 0x19f   :  { %1192 = vmatpush1.msra.mxu1 %v4118_v53 }
 0x1a0   :  { %1193 = vmatprep.subr.mxu1 %v4122_v55 }
 0x1a1   :  { %1194 = vmatpush1.msra.mxu1 %v4126_v47 }
 0x1a2   :  { %1711 = vmatprep.subr.bf16.mxu1 %v3226_v56  ;;  %v960_v56 = vld [vmem:[%s4453_s3 + $0x1] sm:$0x1] }
 0x23a   :  { %v2955_v63 = vpop.f32.mrf.mxu1 }
 0x23c   :  { %v2956_v50 = vpop.f32.mrf.mxu1 }
 0x23d   :  { %v2957_v58 = vadd.f32 %v2956_v50, %v2955_v63  ;;  %v3218_v50 = vld [vmem:[#allocation4 + $0x70] ss:$8 sps:$4 sm:$0xff]  }
 0x23f   :  { %v1150_v0 = vmul.f32 0.0078125, %v2957_v58  ;;  %v3230_v58 = vld [vmem:[#allocation4 + $0x160] ss:$8 sps:$4 sm:$0xff]  }
 0x241   :  { %v1152_v61 = vmul.f32 %v1150_v0, %v1150_v0 }
 0x25a   :  { %v2990_v1 = vpop.f32.mrf.mxu1 }
 0x25c   :  { %v2991_v59 = vpop.f32.mrf.mxu1 }
 0x25d   :  { %v2992_v60 = vadd.f32 %v2991_v59, %v2990_v1  ;;  %v3223_v59 = vld [vmem:[#allocation4 + $0x64] ss:$8 sps:$4 sm:$0xff]  }
 0x25f   :  { %v1151_v7 = vmul.f32 0.0078125, %v2992_v60  ;;  %v3238_v60 = vld [vmem:[#allocation4 + $0x154] ss:$8 sps:$4 sm:$0xff]  }
 0x261   :  { %v1153_v24 = vsub.f32 %v1151_v7, %v1152_v61  ;;  %v3221_v61 = vld [vmem:[#allocation4 + $0x60] ss:$8 sps:$4 sm:$0xff]   ;;  %v3236_v7 = vld [vmem:[#allocation4 + $0x150] ss:$8 sps:$4 sm:$0xff]  }
 0x263   :  { %v1154_v46 = vadd.f32 1e-05, %v1153_v24  ;;  %v3229_v24 = vld [vmem:[#allocation4 + $0x54] ss:$8 sps:$4 sm:$0xff]  }
 0x265   :  { %3366 = vrsqrt.f32 %v1154_v46  ;;  %v3244_v46 = vld [vmem:[#allocation4 + $0x144] ss:$8 sps:$4 sm:$0xff]  }
 0x272   :  { %v3367_v2 = vpop.eup %3366 }
 0x273   :  { %v1156_v5 = vmul.f32 %v3367_v2, %v959_v62  ;;  %v3242_v62 = vld [vmem:[#allocation4 + $0x140] ss:$8 sps:$4 sm:$0xff]   ;;  %v3235_v2 = vld [vmem:[#allocation4 + $0x44] ss:$8 sps:$4 sm:$0xff]  }
 0x275   :  { %v1157_v63 = vmul.f32 %v1156_v5, %v1150_v0  ;;  %2806 = vmatmul.mubr.msk.f32.vlgmr.msra.gmra.mxu1 %vm4462_vm4, %v1156_v5  ;;  %v3227_v0 = vld [vmem:[#allocation4 + $0x50] ss:$8 sps:$4 sm:$0xff]   ;;  %v3233_v5 = vld [vmem:[#allocation4 + $0x40] ss:$8 sps:$4 sm:$0xff]  }
 0x276   :  { %1712 = vmatpush1.bf16.msra.mxu1 %v3224_v4  ;;  %v3250_v4 = vld [vmem:[#allocation4 + $0x134] ss:$8 sps:$4 sm:$0xff]  }
 0x277   :  { %v1158_v1 = vsub.f32 %v960_v56, %v1157_v63  ;;  %1713 = vmatprep.subr.bf16.mxu1 %v3232_v57  ;;  %v3248_v57 = vld [vmem:[#allocation4 + $0x130] ss:$8 sps:$4 sm:$0xff]   ;;  %v3241_v56 = vld [vmem:[#allocation4 + $0x34] ss:$8 sps:$4 sm:$0xff]   ;;  %v3256_v63 = vld [vmem:[#allocation4 + $0x124] ss:$8 sps:$4 sm:$0xff]  }
 0x279   :  { %2807 = vmatmul.mubr.msk.f32.vlgmr.msra.gmra.mxu0 %vm4462_vm4, %v1158_v1  ;;  %v3247_v1 = vld [vmem:[#allocation4 + $0x24] ss:$8 sps:$4 sm:$0xff]   ;;  %vm1363_vm4 = vmand %vm1361_vm14, %vm1362_vm15  ;;  %vm1385_vm15 = vsmask.f32 4368 }
 0x27a   :  { %1932 = vmatpush1.bf16.msra.mxu0 %v3218_v50  ;;  %1714 = vmatpush1.bf16.msra.mxu1 %v3230_v58  ;;  %v3239_v50 = vld [vmem:[#allocation4 + $0x30] ss:$8 sps:$4 sm:$0xff]   ;;  %v3254_v58 = vld [vmem:[#allocation4 + $0x120] ss:$8 sps:$4 sm:$0xff]   ;;  %vm1364_vm5 = vmor %vm1363_vm4, %vm1360_vm2  ;;  %vm1415_vm4 = vcmask 1043456  }
 0x27b   :  { %1933 = vmatprep.subr.bf16.mxu0 %v3223_v59  ;;  %1715 = vmatprep.subr.bf16.mxu1 %v3238_v60  ;;  %v3245_v59 = vld [vmem:[#allocation4 + $0x20] ss:$8 sps:$4 sm:$0xff]   ;;  %v3253_v60 = vld [vmem:[#allocation4 + $0x14] ss:$8 sps:$4 sm:$0xff]  }
 0x27e   :  { %1934 = vmatpush1.bf16.msra.mxu0 %v3221_v61  ;;  %1716 = vmatpush1.bf16.msra.mxu1 %v3236_v7  ;;  %v3251_v61 = vld [vmem:[#allocation4 + $0x10] ss:$8 sps:$4 sm:$0xff]   ;;  %v3259_v7 = vld [vmem:[#allocation4 + $0x4] ss:$8 sps:$4 sm:$0xff]  }
 0x27f   :  { %1935 = vmatprep.subr.bf16.mxu0 %v3229_v24  ;;  %1717 = vmatprep.subr.bf16.mxu1 %v3244_v46  ;;  %v3257_v24 = vld [vmem:[#allocation4] ss:$8 sps:$4 sm:$0xff]   ;;  %v3265_v46 = vld [vmem:[#allocation4 + $0xf4] ss:$8 sps:$4 sm:$0xff]  }
 0x282   :  { %1936 = vmatpush1.bf16.msra.mxu0 %v3227_v0  ;;  %1718 = vmatpush1.bf16.msra.mxu1 %v3242_v62  ;;  %v3263_v0 = vld [vmem:[#allocation4 + $0xf0] ss:$8 sps:$4 sm:$0xff]   ;;  %v3262_v62 = vld [vmem:[#allocation4 + $0x114] ss:$8 sps:$4 sm:$0xff]  }
 0x283   :  { %1937 = vmatprep.subr.bf16.mxu0 %v3235_v2  ;;  %1719 = vmatprep.subr.bf16.mxu1 %v3250_v4  ;;  %v3271_v2 = vld [vmem:[#allocation4 + $0xe4] ss:$8 sps:$4 sm:$0xff]   ;;  %v3260_v4 = vld [vmem:[#allocation4 + $0x110] ss:$8 sps:$4 sm:$0xff]  }
 0x286   :  { %1938 = vmatpush1.bf16.msra.mxu0 %v3233_v5  ;;  %1720 = vmatpush1.bf16.msra.mxu1 %v3248_v57  ;;  %v3269_v5 = vld [vmem:[#allocation4 + $0xe0] ss:$8 sps:$4 sm:$0xff]   ;;  %v3268_v57 = vld [vmem:[#allocation4 + $0x104] ss:$8 sps:$4 sm:$0xff]  }
 0x287   :  { %1939 = vmatprep.subr.bf16.mxu0 %v3241_v56  ;;  %1721 = vmatprep.subr.bf16.mxu1 %v3256_v63  ;;  %v3277_v56 = vld [vmem:[#allocation4 + $0xd4] ss:$8 sps:$4 sm:$0xff]   ;;  %v3266_v63 = vld [vmem:[#allocation4 + $0x100] ss:$8 sps:$4 sm:$0xff]  }
 0x28a   :  { %1940 = vmatpush1.bf16.msra.mxu0 %v3239_v50  ;;  %1722 = vmatpush1.bf16.msra.mxu1 %v3254_v58  ;;  %v3275_v50 = vld [vmem:[#allocation4 + $0xd0] ss:$8 sps:$4 sm:$0xff]   ;;  %v3283_v58 = vld [vmem:[#allocation4 + $0xc4] ss:$8 sps:$4 sm:$0xff]  }
 0x28b   :  { %1941 = vmatprep.subr.bf16.mxu0 %v3247_v1  ;;  %1723 = vmatprep.subr.bf16.mxu1 %v3262_v62  ;;  %v3274_v1 = vld [vmem:[#allocation4 + $0x1f4] ss:$8 sps:$4 sm:$0xff]   ;;  %v1365_v62 = vld [vmem:[#allocation3] sm:$0x22] }
 0x28e   :  { %1942 = vmatpush1.bf16.msra.mxu0 %v3245_v59  ;;  %1724 = vmatpush1.bf16.msra.mxu1 %v3260_v4  ;;  %v3281_v59 = vld [vmem:[#allocation4 + $0xc0] ss:$8 sps:$4 sm:$0xff]   ;;  %v3286_v4 = vld [vmem:[#allocation4 + $0x1d4] ss:$8 sps:$4 sm:$0xff]  }
 0x28f   :  { %1943 = vmatprep.subr.bf16.mxu0 %v3253_v60  ;;  %1725 = vmatprep.subr.bf16.mxu1 %v3268_v57  ;;  %v3272_v60 = vld [vmem:[#allocation4 + $0x1f0] ss:$8 sps:$4 sm:$0xff]   ;;  %v3295_v57 = vld [vmem:[#allocation4 + $0xa4] ss:$8 sps:$4 sm:$0xff]  }
 0x292   :  { %1944 = vmatpush1.bf16.msra.mxu0 %v3251_v61  ;;  %1726 = vmatpush1.bf16.msra.mxu1 %v3266_v63  ;;  %v3280_v61 = vld [vmem:[#allocation4 + $0x1e4] ss:$8 sps:$4 sm:$0xff]   ;;  %v3293_v63 = vld [vmem:[#allocation4 + $0xa0] ss:$8 sps:$4 sm:$0xff]  }
 0x293   :  { %1945 = vmatprep.subr.bf16.mxu0 %v3259_v7  ;;  %1727 = vmatprep.subr.bf16.mxu1 %v3274_v1  ;;  %v3287_v7 = vld [vmem:[#allocation4 + $0xb0] ss:$8 sps:$4 sm:$0xff]   ;;  %v3292_v1 = vld [vmem:[#allocation4 + $0x1c4] ss:$8 sps:$4 sm:$0xff]  }
 0x296   :  { %1946 = vmatpush1.bf16.msra.mxu0 %v3257_v24  ;;  %1728 = vmatpush2.bf16.msra.mxu1 %v3272_v60  ;;  %v1355_v24 = vld [vmem:[#allocation3 + $0x10] sm:$0x11] }
 0x297   :  { %1947 = vmatprep.subr.bf16.mxu0 %v3265_v46  ;;  %v3278_v46 = vld [vmem:[#allocation4 + $0x1e0] ss:$8 sps:$4 sm:$0xff]   ;;  %1729 = vmatprep.subr.bf16.mxu1 %v3280_v61  ;;  %v3298_v60 = vld [vmem:[#allocation4 + $0x1b4] ss:$8 sps:$4 sm:$0xff]   ;;  %v3296_v61 = vld [vmem:[#allocation4 + $0x1b0] ss:$8 sps:$4 sm:$0xff]  }
 0x29a   :  { %1948 = vmatpush2.bf16.msra.mxu0 %v3263_v0  ;;  %v1356_v0 = vsel %vm1354_vm11, 0, %v1355_v24  ;;  %1730 = vmatpush2.bf16.msra.mxu1 %v3278_v46  ;;  %v3307_v24 = vld [vmem:[#allocation4 + $0x84] ss:$8 sps:$4 sm:$0xff]   ;;  %v3305_v46 = vld [vmem:[#allocation4 + $0x80] ss:$8 sps:$4 sm:$0xff]  }
 0x29b   :  { %1949 = vmatprep.subr.bf16.mxu0 %v3271_v2  ;;  %v3289_v2 = vld [vmem:[#allocation4 + $0xb4] ss:$8 sps:$4 sm:$0xff]   ;;  %1357 = vst [vmem:[#allocation3 + $0x10] sm:$0x11] %v1356_v0  ;;  %1731 = vmatprep.subr.bf16.mxu1 %v3286_v4  ;;  %v3304_v0 = vld [vmem:[#allocation4 + $0x1a4] ss:$8 sps:$4 sm:$0xff]  }
 0x29c   :  { %v3314_v4 = vld [vmem:[#allocation4 + $0x184] ss:$8 sps:$4 sm:$0xff]   ;;  %vm1427_vm11 = vsmask.f32 1280 }
 0x29d   :  { %vm4173_vm2 = vmand %vm968_vm3, %vm1427_vm11 }
 0x29e   :  { %1950 = vmatpush2.bf16.msra.mxu0 %v3269_v5  ;;  %v3284_v5 = vld [vmem:[#allocation4 + $0x1d0] ss:$8 sps:$4 sm:$0xff]  }
 0x29f   :  { %1951 = vmatprep.subr.bf16.mxu0 %v3277_v56  ;;  %v1366_v56 = vsel %vm1364_vm5, 0, %v1365_v62  ;;  %1732 = vmatpush2.bf16.msra.mxu1 %v3284_v5  ;;  %v3310_v62 = vld [vmem:[#allocation4 + $0x194] ss:$8 sps:$4 sm:$0xff]   ;;  %v3312_v5 = vld [vmem:[#allocation4 + $0x180] ss:$8 sps:$4 sm:$0xff]  }
 0x2a0   :  { %1367 = vst [vmem:[#allocation3] sm:$0x22] %v1366_v56  ;;  %1733 = vmatprep.subr.bf16.mxu1 %v3292_v1  ;;  %v4146_v56 = vsub.s32 0, %v4030_v3  ;;  %vm1416_vm5 = vsmask.f32 7938 }
 0x2a1   :  { %vm4158_vm9 = vmand %vm1415_vm4, %vm1416_vm5 }
 0x2a2   :  { %1952 = vmatpush2.bf16.msra.mxu0 %v3275_v50  ;;  %v3301_v50 = vld [vmem:[#allocation4 + $0x94] ss:$8 sps:$4 sm:$0xff]   ;;  %vm1421_vm14 = vmor %vm4164_vm10, %vm4158_vm9 }
 0x2a3   :  { %1953 = vmatprep.subr.bf16.mxu0 %v3283_v58  ;;  %v3290_v58 = vld [vmem:[#allocation4 + $0x1c0] ss:$8 sps:$4 sm:$0xff]   ;;  %vm4177_vm4 = vmand %vm1429_vm12, %vm1430_vm13 }
 0x2a4   :  { %1734 = vmatpush2.bf16.msra.mxu1 %v3290_v58  ;;  %vm1386_vm5 = vmor %vm1349_vm6, %vm1385_vm15  ;;  %vm4479_vm6 = vcmask 1040384  }
 0x2a5   :  { %1735 = vmatprep.subr.bf16.mxu1 %v3298_v60  ;;  %vm1432_vm7 = vmor %vm4177_vm4, %vm4173_vm2 }
 0x2a6   :  { %1954 = vmatpush2.bf16.msra.mxu0 %v3281_v59  ;;  %v3299_v59 = vld [vmem:[#allocation4 + $0x90] ss:$8 sps:$4 sm:$0xff]  }
 0x2a7   :  { %1955 = vmatprep.subr.bf16.mxu0 %v3289_v2  ;;  %v3308_v2 = vld [vmem:[#allocation4 + $0x190] ss:$8 sps:$4 sm:$0xff]  }
 0x2a8   :  { %1736 = vmatpush2.bf16.msra.mxu1 %v3296_v61 }
 0x2a9   :  { %1737 = vmatprep.subr.bf16.mxu1 %v3304_v0 }
 0x2aa   :  { %1956 = vmatpush2.bf16.msra.mxu0 %v3287_v7  ;;  %v3302_v7 = vld [vmem:[#allocation4 + $0x1a0] ss:$8 sps:$4 sm:$0xff]  }
 0x2ab   :  { %1957 = vmatprep.subr.bf16.mxu0 %v3295_v57  ;;  %v3318_v57 = vld [vmem:[#allocation4 + $0x274] ss:$8 sps:$4 sm:$0xff]  }
 0x2ac   :  { %1738 = vmatpush2.bf16.msra.mxu1 %v3302_v7 }
 0x2ad   :  { %1739 = vmatprep.subr.bf16.mxu1 %v3310_v62 }
 0x2ae   :  { %1958 = vmatpush2.bf16.msra.mxu0 %v3293_v63 }
 0x2af   :  { %1959 = vmatprep.subr.bf16.mxu0 %v3301_v50 }
 0x2b0   :  { %1740 = vmatpush2.bf16.msra.mxu1 %v3308_v2 }
 0x2b1   :  { %1741 = vmatprep.subr.bf16.mxu1 %v3314_v4  ;;  %v4467_v4 = vld [vmem:[#allocation11_spill] sm:$0xff] }
 0x2b2   :  { %1960 = vmatpush2.bf16.msra.mxu0 %v3299_v59 }
 0x2b3   :  { %1961 = vmatprep.subr.bf16.mxu0 %v3307_v24 }
 0x2b4   :  { %1742 = vmatpush2.bf16.msra.mxu1 %v3312_v5 }
 0x2b5   :  { %2190 = vmatprep.subr.bf16.mxu1 %v3318_v57 }
 0x2b6   :  { %1962 = vmatpush2.bf16.msra.mxu0 %v3305_v46 }
 0x2b7   :  { %2993 = vmatprep.subr.mxu0 %v3839_v14 }
 0x335   :  { %v1229_v63 = vpop.f32.mrf.mxu1 }
 0x336   :  { %v1311_v50 = vrot.slane %v1229_v63, %v4146_v56 }
 0x337   :  { %v1231_v58 = vpop.f32.mrf.mxu1 }
 0x338   :  { %v1315_v1 = vrot.slane %v1231_v58, %v4146_v56  ;;  %v1316_v59 = vmul.f32 %v1311_v50, %v4038_v11  ;;  %v1318_v60 = vmul.f32 %v1311_v50, %v4036_v9  ;;  %v1320_v24 = vmul.f32 %v1311_v50, %v4049_v54 }
 0x339   :  { %v1303_v14 = vpop.f32.mrf.mxu0 }
 0x33a   :  { %v1325_v61 = vrot.slane %v1303_v14, %v4146_v56  ;;  %v1317_v0 = vmul.f32 %v1315_v1, %v4040_v45  ;;  %v1319_v2 = vmul.f32 %v1315_v1, %v4044_v48  ;;  %v1321_v5 = vmul.f32 %v1315_v1, %v4467_v4  ;;  %v4470_v48 = vld [vmem:[#allocation10_spill] sm:$0xff] }
 0x33b   :  { %v1305_v46 = vpop.f32.mrf.mxu0 }
 0x33c   :  { %v1330_v3 = vadd.f32 %v1325_v61, %v1316_v59  ;;  %v1332_v7 = vadd.f32 %v1325_v61, %v1318_v60  ;;  %v1329_v62 = vrot.slane %v1305_v46, %v4146_v56  ;;  %v1334_v57 = vadd.f32 %v1325_v61, %v1320_v24 }
 0x33e   :  { %v1331_v63 = vadd.f32 %v1329_v62, %v1317_v0  ;;  %v1338_v11 = vmax.f32 %v1332_v7, 0.0  ;;  %v1333_v9 = vadd.f32 %v1329_v62, %v1319_v2  ;;  %v1335_v58 = vadd.f32 %v1329_v62, %v1321_v5 }
 0x33f   :  { %v1336_v14 = vmax.f32 %v1330_v3, 0.0  ;;  %v1340_v45 = vmax.f32 %v1334_v57, 0.0 }
 0x340   :  { %v1337_v54 = vmax.f32 %v1331_v63, 0.0  ;;  %v1339_v50 = vmax.f32 %v1333_v9, 0.0  ;;  %v1341_v59 = vmax.f32 %v1335_v58, 0.0  ;;  %v1344_v1 = vmul.f32 %v4470_v48, %v1338_v11  ;;  %v1422_v63 = vld [vmem:[#allocation3 + $0x10] sm:$0xff] }
 0x342   :  { %v2920_v60 = vpack.c.bf16 %v1337_v54, %v1336_v14  ;;  %v1345_v61 = vmul.f32 %v4470_v48, %v1339_v50  ;;  %v2922_v24 = vpack.c.bf16 %v1341_v59, %v1340_v45 }
 0x344   :  { %v1388_v3 = vshrl.u32 %v2920_v60, 16  ;;  %v2921_v7 = vpack.c.bf16 %v1345_v61, %v1344_v1  ;;  %v1405_v62 = vshrl.u32 %v2922_v24, 16  ;;  %v1391_v4 = vshll.u32 %v2920_v60, 16  ;;  %v1433_v61 = vld [vmem:[#allocation3] sm:$0x33] }
 0x345   :  { %v1408_v45 = vshll.u32 %v2922_v24, 16 }
 0x346   :  { %v1390_v2 = vrot.slane %v1388_v3, 7  ;;  %v1396_v5 = vshrl.u32 %v2921_v7, 16  ;;  %v1407_v57 = vrot.slane %v1405_v62, 7  ;;  %v1399_v54 = vshll.u32 %v2921_v7, 16 }
 0x348   :  { %v1393_v9 = vor.u32 %v1391_v4, %v1390_v2  ;;  %v1398_v14 = vrot.slane %v1396_v5, 7  ;;  %v1394_v59 = vrot.slane %v1390_v2, 4  ;;  %v1410_v1 = vor.u32 %v1408_v45, %v1407_v57 }
 0x34a   :  { %v1423_v50 = vsel %vm1421_vm14, %v1393_v9, %v1422_v63  ;;  %v1401_v60 = vor.u32 %v1399_v54, %v1398_v14  ;;  %v1403_v46 = vrot.slane %v1398_v14, 4 }
 0x34b   :  { %1424 = vst [vmem:[#allocation3 + $0x10] sm:$0xff] %v1423_v50 }
 0x34c   :  { %v4186_v0 = vsel %vm1386_vm5, %v1394_v59, %v1401_v60  ;;  %v1411_v3 = vsel %vm1386_vm5, %v1403_v46, %v1410_v1 }
 0x34d   :  { %v1434_v62 = vsel %vm1432_vm7, %v1411_v3, %v1433_v61  ;;  %v2811_v24 = vcombine.low %v1423_v50, %v4186_v0  ;;  %v2812_v7 = vcombine.high %v1423_v50, %v4186_v0 }
 0x34e   :  { %1435 = vst [vmem:[#allocation3] sm:$0x33] %v1434_v62 }
 0x34f   :  { %1963 = vmatprep.mubr.bf16.mxu0 %v2812_v7  ;;  %v1532_v2 = vshll.u32 %v2812_v7, 16  ;;  %v1520_v4 = vshll.u32 %v2811_v24, 16 }
 0x350   :  { %1964 = vmatmul.mubr.bf16.vlgmr.msra.gmra.mxu0 %v2811_v24 }
 0x351   :  { %2994 = vmatpush3.msra.mxu0 %v3844_v15  ;;  %v1534_v11 = vrot.slane %v1532_v2, 1  ;;  %v1522_v9 = vrot.slane %v1520_v4, 1  ;;  %v3326_v2 = vld [vmem:[#allocation4 + $0x254] ss:$8 sps:$4 sm:$0xff]  }
 0x352   :  { %v1982_v5 = vld [vmem:[#allocation3 + $0x10] sm:$0xee]  ;;  %2995 = vmatprep.subr.mxu0 %v3849_v16  ;;  %v1530_v16 = vshrl.u32 %v2812_v7, 16  ;;  %v3323_v7 = vld [vmem:[#allocation4 + $0x264] ss:$8 sps:$4 sm:$0xff]  }
 0x353   :  { %2996 = vmatpush3.msra.mxu0 %v3855_v12  ;;  %v2881_v58 = vcombine.low %v1982_v5, %v4186_v0 }
 0x354   :  { %2997 = vmatprep.subr.mxu0 %v3863_v13  ;;  %v1518_v13 = vshrl.u32 %v2811_v24, 16 }
 0x355   :  { %v1438_v57 = vld [vmem:[#allocation3] sm:$0x11]  ;;  %2998 = vmatpush3.msra.mxu0 %v3869_v17  ;;  %v1535_v17 = vor.u32 %v1534_v11, %v1530_v16  ;;  %v2020_v59 = vrot.slane %v2881_v58, 1  ;;  %v3354_v11 = vld [vmem:[#allocation4 + $0x2b0] ss:$8 sps:$4 sm:$0xff]  }
 0x356   :  { %v1471_v63 = vld [vmem:[#allocation3] sm:$0x33]  ;;  %v2848_v14 = vcombine.high %v1438_v57, %v1438_v57  ;;  %v2847_v15 = vcombine.low %v1438_v57, %v1438_v57  ;;  %2999 = vmatprep.subr.mxu0 %v3875_v18  ;;  %v1523_v1 = vor.u32 %v1522_v9, %v1518_v13 }
 0x357   :  { %v4196_v54 = vcombine.high %v1471_v63, %v1471_v63  ;;  %v4198_v45 = vcombine.low %v1471_v63, %v1471_v63  ;;  %3000 = vmatpush3.msra.mxu0 %v3881_v19  ;;  %v3316_v19 = vld [vmem:[#allocation4 + $0x270] ss:$8 sps:$4 sm:$0xff]   ;;  %v3329_v63 = vld [vmem:[#allocation4 + $0x244] ss:$8 sps:$4 sm:$0xff]   ;;  %v3357_v58 = vld [vmem:[#allocation4 + $0x2a0] ss:$8 sps:$4 sm:$0xff]  }
 0x358   :  { %1973 = vmatprep.mubr.bf16.mxu0 %v2848_v14  ;;  %3001 = vmatprep.subr.mxu0 %v3887_v20  ;;  %v3359_v9 = vld [vmem:[#allocation4 + $0x2a4] ss:$8 sps:$4 sm:$0xff]   ;;  %v3362_v14 = vld [vmem:[#allocation4 + $0x294] ss:$8 sps:$4 sm:$0xff]  }
 0x359   :  { %v1537_v12 = vshll.u32 %v4196_v54, 16  ;;  %v1525_v50 = vshll.u32 %v4198_v45, 16  ;;  %1974 = vmatmul.mubr.bf16.gmra.mxu0 %v2847_v15  ;;  %v2021_v60 = vrot.slane %v4198_v45, 1  ;;  %v1544_v18 = vshrl.u32 %v4196_v54, 16  ;;  %v3360_v15 = vld [vmem:[#allocation4 + $0x290] ss:$8 sps:$4 sm:$0xff]  }
 0x35a   :  { %3002 = vmatpush3.msra.mxu0 %v3893_v21  ;;  %v3321_v21 = vld [vmem:[#allocation4 + $0x260] ss:$8 sps:$4 sm:$0xff]   ;;  %v1541_v4 = vshrl.u32 %v4198_v45, 16  ;;  %v3365_v16 = vld [vmem:[#allocation4 + $0x284] ss:$8 sps:$4 sm:$0xff]  }
 0x35b   :  { %v1539_v46 = vrot.slane %v1537_v12, 1  ;;  %v1527_v61 = vrot.slane %v1525_v50, 1  ;;  %v4211_v3 = vsel %vm731_vm1, %v2020_v59, %v2021_v60  ;;  %3003 = vmatprep.subr.mxu0 %v3899_v22  ;;  %v2882_v22 = vcombine.high %v1982_v5, %v4186_v0  ;;  %v3351_v0 = vld [vmem:[#allocation4 + $0x2c0] ss:$8 sps:$4 sm:$0xff]   ;;  %v3356_v5 = vld [vmem:[#allocation4 + $0x2b4] ss:$8 sps:$4 sm:$0xff]  }
 0x35c   :  { %3004 = vmatpush3.msra.mxu0 %v3905_v23  ;;  %v2024_v23 = vrot.slane %v4196_v54, 1  ;;  %v3363_v12 = vld [vmem:[#allocation4 + $0x280] ss:$8 sps:$4 sm:$0xff]  }
 0x35d   :  { %v1540_v20 = vsel %vm227_vm0, %v1535_v17, %v1539_v46  ;;  %v1528_v62 = vsel %vm227_vm0, %v1523_v1, %v1527_v61  ;;  %v1546_v24 = vor.u32 %v1544_v18, %v1539_v46  ;;  %3005 = vmatprep.subr.mxu0 %v3912_v25  ;;  %v3324_v25 = vld [vmem:[#allocation4 + $0x250] ss:$8 sps:$4 sm:$0xff]   ;;  %v2023_v57 = vrot.slane %v2882_v22, 1 }
 0x35e   :  { %1743 = vmatprep.mubr.bf16.mxu1 %v1540_v20  ;;  %3006 = vmatpush3.msra.mxu0 %v3918_v26  ;;  %v1543_v26 = vor.u32 %v1541_v4, %v1527_v61  ;;  %vm4477_vm0 = vcmask 261120  }
 0x35f   :  { %1744 = vmatmul.mubr.bf16.vlgmr.msra.gmra.mxu1 %v1528_v62  ;;  %3007 = vmatprep.subr.mxu0 %v3924_v27  ;;  %v2025_v27 = vsel %vm731_vm1, %v2023_v57, %v2024_v23 }
 0x360   :  { %2191 = vmatpush1.bf16.msra.mxu1 %v3316_v19  ;;  %1753 = vmatprep.mubr.bf16.mxu1 %v1546_v24 }
 0x361   :  { %2192 = vmatprep.subr.bf16.mxu1 %v3323_v7  ;;  %3008 = vmatpush3.msra.mxu0 %v3930_v28  ;;  %v3327_v28 = vld [vmem:[#allocation4 + $0x240] ss:$8 sps:$4 sm:$0xff]  }
 0x362   :  { %3009 = vmatprep.subr.mxu0 %v3936_v29  ;;  %v3332_v29 = vld [vmem:[#allocation4 + $0x234] ss:$8 sps:$4 sm:$0xff]  }
 0x363   :  { %3010 = vmatpush3.msra.mxu0 %v3942_v30  ;;  %v3330_v30 = vld [vmem:[#allocation4 + $0x230] ss:$8 sps:$4 sm:$0xff]  }
 0x364   :  { %2193 = vmatpush1.bf16.msra.mxu1 %v3321_v21  ;;  %3011 = vmatprep.subr.mxu0 %v3948_v31  ;;  %v3335_v31 = vld [vmem:[#allocation4 + $0x224] ss:$8 sps:$4 sm:$0xff]  }
 0x365   :  { %2194 = vmatprep.subr.bf16.mxu1 %v3326_v2  ;;  %3012 = vmatpush3.msra.mxu0 %v3954_v32  ;;  %v3333_v32 = vld [vmem:[#allocation4 + $0x220] ss:$8 sps:$4 sm:$0xff]  }
 0x366   :  { %3013 = vmatprep.subr.mxu0 %v3960_v33  ;;  %v3338_v33 = vld [vmem:[#allocation4 + $0x214] ss:$8 sps:$4 sm:$0xff]  }
 0x367   :  { %1754 = vmatmul.mubr.bf16.gmra.mxu1 %v1543_v26  ;;  %3014 = vmatpush3.msra.mxu0 %v3966_v34  ;;  %v3336_v34 = vld [vmem:[#allocation4 + $0x210] ss:$8 sps:$4 sm:$0xff]  }
 0x368   :  { %2195 = vmatpush1.bf16.msra.mxu1 %v3324_v25  ;;  %2222 = vmatprep.mubr.bf16.mxu1 %v2025_v27 }
 0x369   :  { %2196 = vmatprep.subr.bf16.mxu1 %v3329_v63  ;;  %3015 = vmatprep.subr.mxu0 %v3972_v35  ;;  %v3370_v35 = vld [vmem:[%s4454_s4 + $0xf8] sm:$0xff] }
 0x36a   :  { %3016 = vmatpush3.msra.mxu0 %v3978_v36  ;;  %v3341_v36 = vld [vmem:[#allocation4 + $0x204] ss:$8 sps:$4 sm:$0xff]  }
 0x36b   :  { %3017 = vmatprep.subr.mxu0 %v3984_v37  ;;  %v3339_v37 = vld [vmem:[#allocation4 + $0x200] ss:$8 sps:$4 sm:$0xff]  }
 0x36c   :  { %2197 = vmatpush1.bf16.msra.mxu1 %v3327_v28  ;;  %3018 = vmatpush3.msra.mxu0 %v3990_v38  ;;  %v3344_v38 = vld [vmem:[#allocation4 + $0x2f4] ss:$8 sps:$4 sm:$0xff]  }
 0x36d   :  { %2198 = vmatprep.subr.bf16.mxu1 %v3332_v29  ;;  %3019 = vmatprep.subr.mxu0 %v3996_v39  ;;  %v3342_v39 = vld [vmem:[#allocation4 + $0x2f0] ss:$8 sps:$4 sm:$0xff]  }
 0x36e   :  { %3020 = vmatpush3.msra.mxu0 %v4001_v40  ;;  %v3347_v40 = vld [vmem:[#allocation4 + $0x2e4] ss:$8 sps:$4 sm:$0xff]  }
 0x36f   :  { %3021 = vmatprep.subr.mxu0 %v4006_v41  ;;  %v3345_v41 = vld [vmem:[#allocation4 + $0x2e0] ss:$8 sps:$4 sm:$0xff]  }
 0x370   :  { %2199 = vmatpush1.bf16.msra.mxu1 %v3330_v30  ;;  %3022 = vmatpush3.msra.mxu0 %v4012_v42  ;;  %v3350_v42 = vld [vmem:[#allocation4 + $0x2d4] ss:$8 sps:$4 sm:$0xff]  }
 0x371   :  { %2200 = vmatprep.subr.bf16.mxu1 %v3335_v31  ;;  %3023 = vmatprep.subr.mxu0 %v4018_v43  ;;  %v3348_v43 = vld [vmem:[#allocation4 + $0x2d0] ss:$8 sps:$4 sm:$0xff]  }
 0x372   :  { %3024 = vmatpush3.msra.mxu0 %v4024_v44  ;;  %v3353_v44 = vld [vmem:[#allocation4 + $0x2c4] ss:$8 sps:$4 sm:$0xff]  }
 0x373   :  { %3028 = vmatprep.subr.mxu0 %v3370_v35 }
 0x374   :  { %2201 = vmatpush1.bf16.msra.mxu1 %v3333_v32 }
 0x375   :  { %2202 = vmatprep.subr.bf16.mxu1 %v3338_v33 }
 0x378   :  { %2203 = vmatpush1.bf16.msra.mxu1 %v3336_v34 }
 0x379   :  { %2204 = vmatprep.subr.bf16.mxu1 %v3341_v36 }
 0x37c   :  { %2205 = vmatpush1.bf16.msra.mxu1 %v3339_v37 }
 0x37d   :  { %2206 = vmatprep.subr.bf16.mxu1 %v3344_v38 }
 0x380   :  { %2207 = vmatpush2.bf16.msra.mxu1 %v3342_v39 }
 0x381   :  { %2208 = vmatprep.subr.bf16.mxu1 %v3347_v40 }
 0x384   :  { %2209 = vmatpush2.bf16.msra.mxu1 %v3345_v41 }
 0x385   :  { %2210 = vmatprep.subr.bf16.mxu1 %v3350_v42 }
 0x388   :  { %2211 = vmatpush2.bf16.msra.mxu1 %v3348_v43 }
 0x389   :  { %2212 = vmatprep.subr.bf16.mxu1 %v3353_v44 }
 0x38c   :  { %2213 = vmatpush2.bf16.msra.mxu1 %v3351_v0 }
 0x38d   :  { %2214 = vmatprep.subr.bf16.mxu1 %v3356_v5 }
 0x390   :  { %2215 = vmatpush2.bf16.msra.mxu1 %v3354_v11 }
 0x391   :  { %2216 = vmatprep.subr.bf16.mxu1 %v3359_v9 }
 0x394   :  { %2217 = vmatpush2.bf16.msra.mxu1 %v3357_v58 }
 0x395   :  { %2218 = vmatprep.subr.bf16.mxu1 %v3362_v14 }
 0x398   :  { %2219 = vmatpush2.bf16.msra.mxu1 %v3360_v15 }
 0x399   :  { %2220 = vmatprep.subr.bf16.mxu1 %v3365_v16 }
 0x39c   :  { %2221 = vmatpush2.bf16.msra.mxu1 %v3363_v12 }
 0x39d   :  { %2547 = vmatprep.subr.mxu1 %v4102_v8 }
 0x39f   :  { %2223 = vmatmul.mubr.bf16.vlgmr.msra.gmra.mxu1 %v4211_v3 }
 0x3a0   :  { %2232 = vmatprep.mubr.bf16.mxu1 %v2024_v23  ;;  %2548 = vmatpush1.msra.mxu1 %v4104_v10 }
 0x3a1   :  { %2549 = vmatprep.subr.mxu1 %v4106_v49 }
 0x3a2   :  { %2550 = vmatpush1.msra.mxu1 %v4110_v51 }
 0x3a3   :  { %2551 = vmatprep.subr.mxu1 %v4114_v52 }
 0x3a4   :  { %2552 = vmatpush1.msra.mxu1 %v4118_v53 }
 0x3a5   :  { %2553 = vmatprep.subr.mxu1 %v4122_v55 }
 0x3a6   :  { %2554 = vmatpush1.msra.mxu1 %v4126_v47 }
 0x3a7   :  { %2233 = vmatmul.mubr.bf16.gmra.mxu1 %v2021_v60 }
 0x3a8   :  { %2587 = vmatprep.mubr.f32.mxu1 %v4466_v6 }
 0x410   :  { %v1965_v8 = vpop.f32.mrf.mxu0 }
 0x412   :  { %v1967_v54 = vpop.f32.mrf.mxu0 }
 0x414   :  { %v1969_v10 = vpop.f32.mrf.mxu0 }
 0x416   :  { %v1971_v13 = vpop.f32.mrf.mxu0 }
 0x419   :  { %v1975_v49 = vpop.f32.mrf.mxu0 }
 0x41b   :  { %v1977_v50 = vpop.f32.mrf.mxu0 }
 0x41d   :  { %v1979_v51 = vpop.f32.mrf.mxu0 }
 0x41f   :  { %v1745_v17 = vpop.f32.mrf.mxu1  ;;  %v1980_v59 = vpop.f32.mrf.mxu0 }
 0x420   :  { %v1966_v52 = vadd.f32 %v1965_v8, %v1745_v17  ;;  %v3371_v59 = vld [vmem:[%s4454_s4 + $0x78] sm:$0xff] }
 0x421   :  { %v1747_v53 = vpop.f32.mrf.mxu1 }
 0x422   :  { %v1968_v46 = vadd.f32 %v1967_v54, %v1747_v53 }
 0x423   :  { %v1749_v55 = vpop.f32.mrf.mxu1 }
 0x424   :  { %v1970_v1 = vadd.f32 %v1969_v10, %v1749_v55 }
 0x425   :  { %v1751_v47 = vpop.f32.mrf.mxu1 }
 0x426   :  { %v1972_v61 = vadd.f32 %v1971_v13, %v1751_v47  ;;  %v3374_v47 = vld [vmem:[%s4454_s4 + $0xe8] sm:$0xff] }
 0x427   :  { %v1755_v45 = vpop.f32.mrf.mxu1 }
 0x428   :  { %v1976_v60 = vadd.f32 %v1975_v49, %v1755_v45 }
 0x429   :  { %v1757_v18 = vpop.f32.mrf.mxu1 }
 0x42a   :  { %v1978_v27 = vadd.f32 %v1977_v50, %v1757_v18  ;;  %v3377_v18 = vld [vmem:[%s4454_s4 + $0x60] sm:$0xff] }
 0x42b   :  { %v1759_v19 = vpop.f32.mrf.mxu1 }
 0x42c   :  { %v3378_v19 = vld [vmem:[%s4454_s4 + $0xd8] sm:$0xff] }
 0x42d   :  { %v1760_v3 = vpop.f32.mrf.mxu1 }
 0x42e   :  { %v3379_v3 = vld [vmem:[%s4454_s4 + $0x58] sm:$0xff] }
 0x45f   :  { %v2224_v20 = vpop.f32.mrf.mxu1 }
 0x460   :  { %v4262_v2 = vadd.f32 %v2224_v20, %v1966_v52 }
 0x461   :  { %v2226_v62 = vpop.f32.mrf.mxu1 }
 0x462   :  { %v4264_v22 = vadd.f32 %v2226_v62, %v1968_v46  ;;  %v2273_v52 = vmul.f32 %v4262_v2, %v4262_v2  ;;  %v3372_v46 = vld [vmem:[%s4454_s4 + $0xf0] sm:$0xff] }
 0x463   :  { %v2228_v24 = vpop.f32.mrf.mxu1  ;;  %v3380_v62 = vld [vmem:[%s4454_s4 + $0xd0] sm:$0xff] }
 0x464   :  { %v4260_v7 = vadd.f32 %v2228_v24, %v1970_v1  ;;  %v2274_v29 = vmul.f32 %v4264_v22, %v4264_v22  ;;  %v3373_v1 = vld [vmem:[%s4454_s4 + $0x70] sm:$0xff] }
 0x465   :  { %v2230_v21 = vpop.f32.mrf.mxu1  ;;  %v3381_v24 = vld [vmem:[%s4454_s4 + $0x50] sm:$0xff] }
 0x466   :  { %v2251_v4 = vmul.f32 %v4470_v48, %v4260_v7  ;;  %v4268_v23 = vadd.f32 %v2230_v21, %v1972_v61  ;;  %v3375_v61 = vld [vmem:[%s4454_s4 + $0x68] sm:$0xff] }
 0x467   :  { %v2234_v25 = vpop.f32.mrf.mxu1  ;;  %v3382_v21 = vld [vmem:[%s4454_s4 + $0xc8] sm:$0xff] }
 0x468   :  { %v2255_v26 = vadd.f32 %v2251_v4, %v4262_v2  ;;  %v2252_v57 = vmul.f32 %v4470_v48, %v4268_v23  ;;  %v4273_v63 = vadd.f32 %v2234_v25, %v1976_v60  ;;  %v2275_v49 = vmul.f32 %v2251_v4, %v4260_v7  ;;  %v3376_v60 = vld [vmem:[%s4454_s4 + $0xe0] sm:$0xff]  ;;  %v3383_v4 = vld [vmem:[%s4454_s4 + $0x48] sm:$0xff] }
 0x469   :  { %v2236_v28 = vpop.f32.mrf.mxu1 }
 0x46a   :  { %v2264_v30 = vadd.f32 %v2252_v57, %v4264_v22  ;;  %v2276_v31 = vmul.f32 %v2252_v57, %v4268_v23  ;;  %v2256_v32 = vsel %vm968_vm3, %v4273_v63, 0.0  ;;  %v4281_v34 = vadd.f32 %v2236_v28, %v1978_v27  ;;  %v3385_v57 = vld [vmem:[%s4454_s4 + $0x40] sm:$0xff]  ;;  %v3386_v27 = vld [vmem:[%s4454_s4 + $0xb8] sm:$0xff] }
 0x46b   :  { %v2257_v33 = vadd.f32 %v2256_v32, %v2255_v26  ;;  %v2238_v35 = vpop.f32.mrf.mxu1  ;;  %v2277_v51 = vmul.f32 %v4273_v63, %v4273_v63  ;;  %v2279_v53 = vadd.f32 %v2275_v49, %v2273_v52  ;;  %v3384_v26 = vld [vmem:[%s4454_s4 + $0xc0] sm:$0xff]  ;;  %v3387_v28 = vld [vmem:[%s4454_s4 + $0x38] sm:$0xff]  ;;  %v3390_v32 = vld [vmem:[%s4454_s4 + $0xa8] sm:$0xff] }
 0x46c   :  { %v2288_v36 = vadd.f32 %v2276_v31, %v2274_v29  ;;  %v2265_v37 = vsel %vm968_vm3, %v4281_v34, 0.0  ;;  %v2278_v38 = vmul.f32 %v4281_v34, %v4281_v34  ;;  %v3388_v29 = vld [vmem:[%s4454_s4 + $0xb0] sm:$0xff]  ;;  %v3392_v35 = vld [vmem:[%s4454_s4 + $0xa0] sm:$0xff] }
 0x46d   :  { %v2258_v48 = vrot.slane %v2257_v33, 4  ;;  %v2239_v39 = vpop.f32.mrf.mxu1  ;;  %v2266_v40 = vadd.f32 %v2265_v37, %v2264_v30  ;;  %v2280_v55 = vsel %vm968_vm3, %v2277_v51, 0.0  ;;  %v3389_v31 = vld [vmem:[%s4454_s4 + $0x30] sm:$0xff]  ;;  %v3394_v37 = vld [vmem:[%s4454_s4 + $0x98] sm:$0xff] }
 0x46e   :  { %v2289_v42 = vsel %vm968_vm3, %v2278_v38, 0.0  ;;  %v2281_v45 = vadd.f32 %v2280_v55, %v2279_v53  ;;  %v3395_v38 = vld [vmem:[%s4454_s4 + $0x18] sm:$0xff]  ;;  %v3396_v39 = vld [vmem:[%s4454_s4 + $0x90] sm:$0xff]  ;;  %vm4478_vm3 = vmmov %vm4477_vm0 }
 0x46f   :  { %v2259_v41 = vadd.f32 %v2258_v48, %v2257_v33  ;;  %v2267_v43 = vrot.slane %v2266_v40, 4  ;;  %v2290_v44 = vadd.f32 %v2289_v42, %v2288_v36  ;;  %v3391_v33 = vld [vmem:[%s4454_s4 + $0x28] sm:$0xff]  ;;  %v3393_v48 = vld [vmem:[%s4454_s4 + $0x20] sm:$0xff] }
 0x470   :  { %v2282_v20 = vrot.slane %v2281_v45, 4  ;;  %v3398_v42 = vld [vmem:[%s4454_s4 + $0x88] sm:$0xff] }
 0x471   :  { %v2260_v0 = vrot.slane %v2259_v41, 2  ;;  %v2268_v5 = vadd.f32 %v2267_v43, %v2266_v40  ;;  %v2291_v11 = vrot.slane %v2290_v44, 4  ;;  %v3399_v43 = vld [vmem:[%s4454_s4 + $0x8] sm:$0xff] }
 0x472   :  { %v2283_v25 = vadd.f32 %v2282_v20, %v2281_v45 }
 0x473   :  { %v2261_v9 = vadd.f32 %v2260_v0, %v2259_v41  ;;  %v2269_v58 = vrot.slane %v2268_v5, 2  ;;  %v2292_v14 = vadd.f32 %v2291_v11, %v2290_v44  ;;  %v3397_v41 = vld [vmem:[%s4454_s4 + $0x10] sm:$0xff]  ;;  %v3400_v44 = vld [vmem:[%s4454_s4 + $0x80] sm:$0xff]  ;;  %v3402_v11 = vld [vmem:[#allocation6 + $0x38] sm:$0xff] }
 0x474   :  { %v2284_v30 = vrot.slane %v2283_v25, 2 }
 0x475   :  { %v2270_v15 = vadd.f32 %v2269_v58, %v2268_v5  ;;  %v2293_v16 = vrot.slane %v2292_v14, 2  ;;  %v2262_v12 = vrot.slane %v2261_v9, 1  ;;  %v3401_v5 = vld [vmem:[%s4454_s4] sm:$0xff]  ;;  %v3404_v58 = vld [vmem:[#allocation6 + $0x28] sm:$0xff] }
 0x476   :  { %v2285_v36 = vadd.f32 %v2284_v30, %v2283_v25 }
 0x477   :  { %v2271_v8 = vrot.slane %v2270_v15, 1  ;;  %v2294_v54 = vadd.f32 %v2293_v16, %v2292_v14  ;;  %v2263_v50 = vadd.f32 %v2262_v12, %v2261_v9  ;;  %v3403_v9 = vld [vmem:[#allocation6 + $0x30] sm:$0xff]  ;;  %v3405_v14 = vld [vmem:[#allocation6 + $0x20] sm:$0xff]  ;;  %v3408_v12 = vld [vmem:[#allocation6 + $0x8] sm:$0xff] }
 0x478   :  { %v2286_v40 = vrot.slane %v2285_v36, 1  ;;  %v3407_v16 = vld [vmem:[#allocation6 + $0x10] sm:$0xff] }
 0x479   :  { %v2272_v10 = vadd.f32 %v2271_v8, %v2270_v15  ;;  %v2295_v13 = vrot.slane %v2294_v54, 1  ;;  %v3406_v15 = vld [vmem:[#allocation6 + $0x18] sm:$0xff]  ;;  %v3409_v8 = vld [vmem:[#allocation6] sm:$0xff] }
 0x47a   :  { %v2287_v0 = vadd.f32 %v2286_v40, %v2285_v36 }
 0x47b   :  { %2361 = vmatprep.mubr.f32.mxu0 %v2272_v10  ;;  %v2296_v17 = vadd.f32 %v2295_v13, %v2294_v54 }
 0x47c   :  { %2362 = vmatmul.mubr.f32.vlgmr.msra.gmra.mxu0 %v2263_v50 }
 0x47d   :  { %3029 = vmatpush3.msra.mxu0 %v3371_v59  ;;  %2431 = vmatprep.mubr.f32.mxu0 %v2296_v17 }
 0x47e   :  { %3030 = vmatprep.subr.mxu0 %v3372_v46  ;;  %v2247_v46 = vld [vmem:[%s4453_s3 + $0x2] sm:$0x1] }
 0x47f   :  { %3031 = vmatpush3.msra.mxu0 %v3373_v1 }
 0x480   :  { %3032 = vmatprep.subr.mxu0 %v3374_v47  ;;  %v2248_v47 = vld [vmem:[%s4453_s3 + $0x3] sm:$0x1] }
 0x481   :  { %3033 = vmatpush3.msra.mxu0 %v3375_v61 }
 0x482   :  { %3034 = vmatprep.subr.mxu0 %v3376_v60  ;;  %v2594_v60 = vld [vmem:[%s4450_s0] sm:$0xfe] }
 0x483   :  { %3035 = vmatpush3.msra.mxu0 %v3377_v18  ;;  %v2596_v18 = vld [vmem:[%s4450_s0 + $0x10] sm:$0xff]  ;;  %v2635_v25 = vrot.slane %v2594_v60, 1 }
 0x484   :  { %3036 = vmatprep.subr.mxu0 %v3378_v19  ;;  %v2598_v19 = vld [vmem:[%s4450_s0 + $0x20] sm:$0x7] }
 0x485   :  { %3037 = vmatpush3.msra.mxu0 %v3379_v3 }
 0x486   :  { %3038 = vmatprep.subr.mxu0 %v3380_v62  ;;  %v2595_v62 = vld [vmem:[%s4450_s0 + $0x8] sm:$0xfe] }
 0x487   :  { %3039 = vmatpush3.msra.mxu0 %v3381_v24  ;;  %v2597_v24 = vld [vmem:[%s4450_s0 + $0x18] sm:$0xff] }
 0x488   :  { %3040 = vmatprep.subr.mxu0 %v3382_v21  ;;  %v2599_v21 = vld [vmem:[%s4450_s0 + $0x28] sm:$0x7]  ;;  %v2639_v30 = vrot.slane %v2597_v24, 1 }
 0x489   :  { %3041 = vmatpush3.msra.mxu0 %v3383_v4 }
 0x48a   :  { %3042 = vmatprep.subr.mxu0 %v3384_v26  ;;  %v2636_v26 = vrot.slane %v2596_v18, 1 }
 0x48b   :  { %3043 = vmatpush3.msra.mxu0 %v3385_v57  ;;  %v2641_v57 = vrot.slane %v2598_v19, 1 }
 0x48c   :  { %3044 = vmatprep.subr.mxu0 %v3386_v27 }
 0x48d   :  { %3045 = vmatpush3.msra.mxu0 %v3387_v28 }
 0x48e   :  { %3046 = vmatprep.subr.mxu0 %v3388_v29  ;;  %v2638_v29 = vrot.slane %v2595_v62, 1 }
 0x48f   :  { %3047 = vmatpush3.msra.mxu0 %v3389_v31  ;;  %v2643_v31 = vrot.slane %v2599_v21, 1 }
 0x490   :  { %3048 = vmatprep.subr.mxu0 %v3390_v32 }
 0x491   :  { %3049 = vmatpush3.msra.mxu0 %v3391_v33 }
 0x492   :  { %3050 = vmatprep.subr.mxu0 %v3392_v35 }
 0x493   :  { %3051 = vmatpush3.msra.mxu0 %v3393_v48 }
 0x494   :  { %3052 = vmatprep.subr.mxu0 %v3394_v37  ;;  %v2637_v37 = vsel %vm731_vm1, %v2635_v25, %v2636_v26 }
 0x495   :  { %3053 = vmatpush3.msra.mxu0 %v3395_v38  ;;  %v2642_v38 = vsel %vm731_vm1, %v2636_v26, %v2641_v57 }
 0x496   :  { %3054 = vmatprep.subr.mxu0 %v3396_v39 }
 0x497   :  { %3055 = vmatpush3.msra.mxu0 %v3397_v41 }
 0x498   :  { %3056 = vmatprep.subr.mxu0 %v3398_v42 }
 0x499   :  { %3057 = vmatpush3.msra.mxu0 %v3399_v43 }
 0x49a   :  { %3058 = vmatprep.subr.mxu0 %v3400_v44  ;;  %v2644_v44 = vsel %vm731_vm1, %v2639_v30, %v2643_v31 }
 0x49b   :  { %3059 = vmatpush3.msra.mxu0 %v3401_v5 }
 0x49c   :  { %2432 = vmatmul.mubr.f32.vlgmr.msra.gmra.mxu0 %v2287_v0  ;;  %2473 = vmatprep.subr.mxu0 %v3402_v11 }
 0x49d   :  { %2474 = vmatpush1.msra.mxu0 %v3403_v9  ;;  %2513 = vmatprep.mubr.f32.mxu0 %v4466_v6 }
 0x49e   :  { %2475 = vmatprep.subr.mxu0 %v3404_v58 }
 0x49f   :  { %2476 = vmatpush1.msra.mxu0 %v3405_v14 }
 0x4a0   :  { %2477 = vmatprep.subr.mxu0 %v3406_v15 }
 0x4a1   :  { %2478 = vmatpush1.msra.mxu0 %v3407_v16 }
 0x4a2   :  { %2479 = vmatprep.subr.mxu0 %v3408_v12 }
 0x4a3   :  { %2480 = vmatpush1.msra.mxu0 %v3409_v8 }
 0x53c   :  { %v3025_v54 = vpop.f32.mrf.mxu0 }
 0x53e   :  { %v3026_v10 = vpop.f32.mrf.mxu0 }
 0x53f   :  { %v3027_v13 = vadd.f32 %v3026_v10, %v3025_v54 }
 0x541   :  { %v2437_v50 = vmul.f32 0.0078125, %v3027_v13 }
 0x543   :  { %v2439_v6 = vmul.f32 %v2437_v50, %v2437_v50 }
 0x55c   :  { %v3060_v49 = vpop.f32.mrf.mxu0 }
 0x55e   :  { %v3061_v51 = vpop.f32.mrf.mxu0 }
 0x55f   :  { %v3062_v17 = vadd.f32 %v3061_v51, %v3060_v49 }
 0x561   :  { %v2438_v52 = vmul.f32 0.0078125, %v3062_v17 }
 0x563   :  { %v2440_v59 = vsub.f32 %v2438_v52, %v2439_v6 }
 0x565   :  { %v2441_v53 = vadd.f32 1e-05, %v2440_v59 }
 0x567   :  { %3368 = vrsqrt.f32 %v2441_v53 }
 0x574   :  { %v3369_v55 = vpop.eup %3368 }
 0x575   :  { %v2443_v1 = vmul.f32 %v3369_v55, %v2247_v46 }
 0x577   :  { %v2444_v61 = vmul.f32 %v2443_v1, %v2437_v50  ;;  %2915 = vmatmul.mubr.msk.f32.vlgmr.msra.gmra.mxu0 %vm4477_vm0, %v2443_v1 }
 0x579   :  { %v2445_v45 = vsub.f32 %v2248_v47, %v2444_v61 }
 0x57b   :  { %2916 = vmatmul.mubr.msk.f32.vlgmr.msra.gmra.mxu1 %vm4478_vm3, %v2445_v45 }
 0x637   :  { %v2515_v3 = vpop.f32.mrf.mxu0 }
 0x638   :  { %v2603_v20 = vrot.slane %v2515_v3, %v4146_v56 }
 0x639   :  { %v2517_v4 = vpop.f32.mrf.mxu0 }
 0x63a   :  { %v2607_v27 = vrot.slane %v2517_v4, %v4146_v56  ;;  %v2608_v32 = vmul.f32 %v2603_v20, %v4262_v2  ;;  %v2610_v33 = vmul.f32 %v2603_v20, %v4260_v7  ;;  %v2612_v35 = vmul.f32 %v2603_v20, %v4273_v63 }
 0x63b   :  { %v2589_v28 = vpop.f32.mrf.mxu1  ;;  %v2640_v63 = vsel %vm731_vm1, %v2638_v29, %v2639_v30  ;;  %vm4480_vm1 = vmmov %vm4479_vm6 }
 0x63c   :  { %v2617_v36 = vrot.slane %v2589_v28, %v4146_v56  ;;  %v2609_v48 = vmul.f32 %v2607_v27, %v4264_v22  ;;  %v2611_v2 = vmul.f32 %v2607_v27, %v4268_v23  ;;  %v2613_v7 = vmul.f32 %v2607_v27, %v4281_v34  ;;  %vm4481_vm8 = vmmov %vm4480_vm1 }
 0x63d   :  { %v2591_v39 = vpop.f32.mrf.mxu1  ;;  %vm4482_vm9 = vmmov %vm4480_vm1 }
 0x63e   :  { %v2622_v40 = vadd.f32 %v2617_v36, %v2608_v32  ;;  %v2624_v41 = vadd.f32 %v2617_v36, %v2610_v33  ;;  %v2626_v42 = vadd.f32 %v2617_v36, %v2612_v35  ;;  %v2621_v43 = vrot.slane %v2591_v39, %v4146_v56 }
 0x640   :  { %v2651_v0 = vadd.f32 %v2637_v37, %v2622_v40  ;;  %v2653_v22 = vadd.f32 %v2642_v38, %v2624_v41  ;;  %v2655_v5 = vadd.f32 %v2641_v57, %v2626_v42  ;;  %v2623_v11 = vadd.f32 %v2621_v43, %v2609_v48 }
 0x641   :  { %v2625_v9 = vadd.f32 %v2621_v43, %v2611_v2  ;;  %v2627_v58 = vadd.f32 %v2621_v43, %v2613_v7 }
 0x642   :  { %v2657_v14 = vmax.f32 %v2651_v0, 0.0  ;;  %v2659_v15 = vmax.f32 %v2653_v22, 0.0  ;;  %v2661_v16 = vmax.f32 %v2655_v5, 0.0  ;;  %v2652_v12 = vadd.f32 %v2640_v63, %v2623_v11 }
 0x643   :  { %v2654_v8 = vadd.f32 %v2644_v44, %v2625_v9  ;;  %v2656_v56 = vadd.f32 %v2643_v31, %v2627_v58 }
 0x644   :  { %v2670_v54 = vrot.slane %v2657_v14, 7  ;;  %v2672_v23 = vrot.slane %v2659_v15, 7  ;;  %v2676_v10 = vrot.slane %v2661_v16, 7  ;;  %v2658_v34 = vmax.f32 %v2652_v12, 0.0 }
 0x645   :  { %v2660_v13 = vmax.f32 %v2654_v8, 0.0  ;;  %v2662_v49 = vmax.f32 %v2656_v56, 0.0 }
 0x646   :  { %v2673_v50 = vsel %vm4479_vm6, %v2670_v54, %v2672_v23  ;;  %v2677_v51 = vsel %vm4480_vm1, %v2672_v23, %v2676_v10  ;;  %2686 = vst [vmem:[%s4456_s6] sm:$0xfe] %v2670_v54  ;;  %v2671_v17 = vrot.slane %v2658_v34, 7 }
 0x647   :  { %2688 = vst [vmem:[%s4456_s6 + $0x10] sm:$0xff] %v2673_v50  ;;  %2690 = vst [vmem:[%s4456_s6 + $0x20] sm:$0x7] %v2677_v51  ;;  %v2674_v6 = vrot.slane %v2660_v13, 7  ;;  %v2678_v52 = vrot.slane %v2662_v49, 7 }
 0x648   :  { %2687 = vst [vmem:[%s4456_s6 + $0x8] sm:$0xfe] %v2671_v17 }
 0x649   :  { %v2675_v59 = vsel %vm4481_vm8, %v2671_v17, %v2674_v6  ;;  %v2679_v53 = vsel %vm4482_vm9, %v2674_v6, %v2678_v52 }
 0x64a   :  { %2689 = vst [vmem:[%s4456_s6 + $0x18] sm:$0xff] %v2675_v59  ;;  %2691 = vst [vmem:[%s4456_s6 + $0x28] sm:$0x7] %v2679_v53 }
 0x64b   :  { %2696 = vsyncpa [#allocation5], 1 }
 0x64c   :  { %2697 = vsyncpa [#allocation7], 1 }

</bundles_post_ra>
